<compile_context>
chip_gen: v7x
topology: tpu7x:2x2x1
jax: 0.10.0
libtpu: 0.0.40
codegen_flags: <defaults>
</compile_context>

<pallas_src>
import functools

import jax
import jax.numpy as jnp
from jax import lax
from jax.experimental import pallas as pl
from jax.experimental.pallas import tpu as pltpu

_EPS = 1e-5


def _upblock_kernel(
    x_ref, s_ref, mask_ref,
    g0x_ref, b0x_ref, g0s_ref, b0s_ref,
    w1_ref, b1_ref, g1_ref, be1_ref,
    w2_ref, b2_ref, g2_ref, be2_ref,
    o_ref, taps_ref, *, Wo, eps):
    f32 = jnp.float32
    Cx, M = x_ref.shape
    Cs = s_ref.shape[0]
    Cin = Cx + Cs

    def bn(v, g, b):
        # One-pass training-mode batch stats (f32): var = E[x^2] - mean^2.
        m = jnp.mean(v, axis=1, keepdims=True)
        ex2 = jnp.mean(v * v, axis=1, keepdims=True)
        return (v - m) * lax.rsqrt(ex2 - m * m + eps) * g + b

    # bn0(cat(up(x), skip)) is per-channel, so the two slabs normalize
    # independently (x_ref already holds the upsampled x slab).
    xn = bn(x_ref[...], g0x_ref[...], b0x_ref[...])          # (Cx, M)
    sn = bn(s_ref[...], g0s_ref[...], b0s_ref[...])          # (Cs, M)

    # ---- stack the 9 shifted+masked conv taps into the (9*Cin, M) scratch ----
    # tap t <-> (di, dj) = (t//3 - 1, t%3 - 1); rows [t*Cin, (t+1)*Cin).
    for t in range(9):
        di, dj = t // 3 - 1, t % 3 - 1
        sft = di * Wo + dj
        if sft == 0:                                          # center tap
            xt, st = xn, sn
        else:
            mrow = mask_ref[t:t + 1, :]                       # (1, M)
            # roll so tap[:, p] == h0[:, p + sft]; circular wrap positions are
            # exactly the mask-zeroed (out-of-image) ones.
            xt = pltpu.roll(xn, shift=(-sft) % M, axis=1) * mrow
            st = pltpu.roll(sn, shift=(-sft) % M, axis=1) * mrow
        taps_ref[t * Cin: t * Cin + Cx, :] = xt
        taps_ref[t * Cin + Cx: (t + 1) * Cin, :] = st

    # ---- conv1 as ONE MXU matmul (K = 9*Cin), then bn1 + ReLU ---------------
    h1 = jnp.dot(w1_ref[...], taps_ref[...],
                 preferred_element_type=f32) + b1_ref[...]    # (Cout, M)
    h1 = jnp.maximum(bn(h1, g1_ref[...], be1_ref[...]), 0.0)

    # ---- conv2 (1x1) + bn2 + ReLU -------------------------------------------
    h2 = jnp.dot(w2_ref[...], h1, preferred_element_type=f32) + b2_ref[...]
    o_ref[...] = jnp.maximum(bn(h2, g2_ref[...], be2_ref[...]), 0.0)


def up_block_pallas(params, x_nchw, skip_nchw, eps=_EPS):
    """UpBlock forward.  x: (N,Cx,H,W), skip: (N,Cs,Ho,Wo) -> (N,Cout,Ho,Wo)."""
    N, Cx, H, W = x_nchw.shape
    Ns, Cs, Ho, Wo = skip_nchw.shape
    assert Ns == N and Ho % H == 0 and Wo % W == 0
    sfh, sfw = Ho // H, Wo // W
    Cin = Cx + Cs
    Cout = params["conv1_w"].shape[0]
    M = N * Ho * Wo

    # Nearest-neighbour upsample fused into the NCHW -> lane-dense [C, M]
    # layout transform (a single XLA fusion; no in-kernel gather / one-hot).
    x_up = jnp.broadcast_to(x_nchw[:, :, :, None, :, None],
                            (N, Cx, H, sfh, W, sfw)).reshape(N, Cx, Ho, Wo)
    x2d = jnp.transpose(x_up, (1, 0, 2, 3)).reshape(Cx, M)
    s2d = jnp.transpose(skip_nchw, (1, 0, 2, 3)).reshape(Cs, M)

    # Host-precomputed per-tap boundary masks (9, M) f32.
    pidx = jnp.arange(M, dtype=jnp.int32)
    w_i = pidx % Wo
    h_i = (pidx // Wo) % Ho
    rows = []
    for t in range(9):
        di, dj = t // 3 - 1, t % 3 - 1
        rows.append((h_i + di >= 0) & (h_i + di < Ho)
                    & (w_i + dj >= 0) & (w_i + dj < Wo))
    masks = jnp.stack(rows, axis=0).astype(jnp.float32)       # (9, M)

    col = lambda v: v.reshape(-1, 1).astype(jnp.float32)
    # conv1 OIHW -> (Cout, 9*Cin); column order matches the tap-major,
    # channel-minor rows of the in-kernel tap scratch.
    w1 = jnp.transpose(params["conv1_w"], (0, 2, 3, 1)).reshape(Cout, 9 * Cin)
    w2 = params["conv2_w"].reshape(Cout, Cout)

    args = (
        x2d, s2d, masks,
        col(params["bn0_g"][:Cx]), col(params["bn0_b"][:Cx]),
        col(params["bn0_g"][Cx:]), col(params["bn0_b"][Cx:]),
        w1, col(params["conv1_b"]), col(params["bn1_g"]), col(params["bn1_b"]),
        w2, col(params["conv2_b"]), col(params["bn2_g"]), col(params["bn2_b"]),
    )

    # Explicit scoped-VMEM limit sized from the actual slab footprint
    # (defaults are only 16/32 MiB), capped below physical VMEM (64 MiB v7x).
    footprint = 4 * M * (Cx + Cs + 9 + 9 * Cin + 4 * Cout + 2 * Cin)
    try:
        vmem_cap = int(pltpu.get_tpu_info().vmem_capacity_bytes)
    except Exception:
        vmem_cap = 64 << 20
    vmem_limit = int(min(max(2 * footprint, 32 << 20), (vmem_cap * 7) // 8))

    vmem_spec = pl.BlockSpec(memory_space=pltpu.MemorySpace.VMEM)
    out2d = pl.pallas_call(
        functools.partial(_upblock_kernel, Wo=Wo, eps=eps),
        out_shape=jax.ShapeDtypeStruct((Cout, M), jnp.float32),
        # No grid: single resident block, single-buffered operands (no dead
        # double-buffer VMEM).
        in_specs=[vmem_spec] * len(args),
        out_specs=vmem_spec,
        scratch_shapes=[pltpu.VMEM((9 * Cin, M), jnp.float32)],
        compiler_params=pltpu.CompilerParams(vmem_limit_bytes=vmem_limit),
    )(*args)

    return jnp.transpose(out2d.reshape(Cout, N, Ho, Wo), (1, 0, 2, 3))  # NCHW


# ----------------------------------------------------------------------------
# Pure-JAX reference (straightforward translation of the PyTorch forward).
# ----------------------------------------------------------------------------
def up_block_ref(params, x_nchw, skip_nchw, eps=_EPS):
    def bn(x, g, b):
        m = jnp.mean(x, axis=(0, 2, 3), keepdims=True)
        v = jnp.mean(jnp.square(x - m), axis=(0, 2, 3), keepdims=True)
        return ((x - m) * lax.rsqrt(v + eps) * g.reshape(1, -1, 1, 1)
                + b.reshape(1, -1, 1, 1))

    x = jnp.repeat(jnp.repeat(x_nchw, 2, axis=2), 2, axis=3)
    x = jnp.concatenate([x, skip_nchw], axis=1)
    x = bn(x, params["bn0_g"], params["bn0_b"])
    x = lax.conv_general_dilated(x, params["conv1_w"], (1, 1), "SAME",
                                 dimension_numbers=("NCHW", "OIHW", "NCHW"),
                                 precision=lax.Precision.HIGHEST)
    x = x + params["conv1_b"].reshape(1, -1, 1, 1)
    x = jnp.maximum(bn(x, params["bn1_g"], params["bn1_b"]), 0.0)
    x = lax.conv_general_dilated(x, params["conv2_w"], (1, 1), "SAME",
                                 dimension_numbers=("NCHW", "OIHW", "NCHW"),
                                 precision=lax.Precision.HIGHEST)
    x = x + params["conv2_b"].reshape(1, -1, 1, 1)
    x = jnp.maximum(bn(x, params["bn2_g"], params["bn2_b"]), 0.0)
    return x


# ----------------------------------------------------------------------------
# Deterministic parameter construction (PyTorch-like layouts: OIHW weights).
# ----------------------------------------------------------------------------
def init_params(key, cx, cs, cout):
    cin = cx + cs
    k = jax.random.split(key, 10)
    n = lambda kk, shape, s: s * jax.random.normal(kk, shape, jnp.float32)
    return {
        "bn0_g": 1.0 + n(k[0], (cin,), 0.1), "bn0_b": n(k[1], (cin,), 0.1),
        "conv1_w": n(k[2], (cout, cin, 3, 3), 0.1), "conv1_b": n(k[3], (cout,), 0.05),
        "bn1_g": 1.0 + n(k[4], (cout,), 0.1), "bn1_b": n(k[5], (cout,), 0.1),
        "conv2_w": n(k[6], (cout, cout, 1, 1), 0.1), "conv2_b": n(k[7], (cout,), 0.05),
        "bn2_g": 1.0 + n(k[8], (cout,), 0.1), "bn2_b": n(k[9], (cout,), 0.1),
    }


# ----------------------------------------------------------------------------
if __name__ == "__main__":
    # UpBlock(in_channels=24, out_channels=16); x provides 16 channels at 8x8,
    # skip provides 8 channels at 16x16 (post-upsample resolution).
    N, Cx, Cs, Cout = 2, 16, 8, 16
    H = W = 8

    key = jax.random.PRNGKey(0)
    kp, kx, ks = jax.random.split(key, 3)
    params = init_params(kp, Cx, Cs, Cout)
    x = jax.random.normal(kx, (N, Cx, H, W), jnp.float32)
    skip = jax.random.normal(ks, (N, Cs, 2 * H, 2 * W), jnp.float32)

    fwd = jax.jit(up_block_pallas)
    out = fwd(params, x, skip)
    jax.block_until_ready(out)

    assert out.shape == (N, Cout, 2 * H, 2 * W)
    ref = up_block_ref(params, x, skip)
    err = float(jnp.max(jnp.abs(out - ref)))
    assert err < 1e-3, f"mismatch vs reference: max abs err {err}"
    print("KERNEL_OK")
</pallas_src>

<mosaic_0001>
module attributes {stable_mosaic.version = 11 : i64} {
  func.func @_upblock_kernel(%arg0: memref<16x512xf32, #tpu.memory_space<vmem>>, %arg1: memref<8x512xf32, #tpu.memory_space<vmem>>, %arg2: memref<9x512xf32, #tpu.memory_space<vmem>>, %arg3: memref<16x1xf32, #tpu.memory_space<vmem>>, %arg4: memref<16x1xf32, #tpu.memory_space<vmem>>, %arg5: memref<8x1xf32, #tpu.memory_space<vmem>>, %arg6: memref<8x1xf32, #tpu.memory_space<vmem>>, %arg7: memref<16x216xf32, #tpu.memory_space<vmem>>, %arg8: memref<16x1xf32, #tpu.memory_space<vmem>>, %arg9: memref<16x1xf32, #tpu.memory_space<vmem>>, %arg10: memref<16x1xf32, #tpu.memory_space<vmem>>, %arg11: memref<16x16xf32, #tpu.memory_space<vmem>>, %arg12: memref<16x1xf32, #tpu.memory_space<vmem>>, %arg13: memref<16x1xf32, #tpu.memory_space<vmem>>, %arg14: memref<16x1xf32, #tpu.memory_space<vmem>>, %arg15: memref<16x512xf32, #tpu.memory_space<vmem>>, %arg16: memref<216x512xf32, #tpu.memory_space<vmem>>) attributes {dimension_semantics = [], scalar_prefetch = 0 : i64, scratch_operands = 1 : i64, tpu.core_type = #tpu.core_type<tc>} {
    %c0 = arith.constant 0 : index
    %c0_0 = arith.constant 0 : index
    %0 = vector.load %arg0[%c0, %c0_0] : memref<16x512xf32, #tpu.memory_space<vmem>>, vector<16x512xf32>
    %c0_1 = arith.constant 0 : index
    %c0_2 = arith.constant 0 : index
    %1 = vector.load %arg3[%c0_1, %c0_2] : memref<16x1xf32, #tpu.memory_space<vmem>>, vector<16x1xf32>
    %c0_3 = arith.constant 0 : index
    %c0_4 = arith.constant 0 : index
    %2 = vector.load %arg4[%c0_3, %c0_4] : memref<16x1xf32, #tpu.memory_space<vmem>>, vector<16x1xf32>
    %cst = arith.constant dense<0.000000e+00> : vector<16xf32>
    %3 = vector.multi_reduction <add>, %0, %cst [1] : vector<16x512xf32> to vector<16xf32>
    %4 = vector.shape_cast %3 : vector<16xf32> to vector<16x1xf32>
    %cst_5 = arith.constant 5.120000e+02 : f32
    %5 = vector.broadcast %cst_5 : f32 to vector<16x1xf32>
    %6 = arith.divf %4, %5 : vector<16x1xf32>
    %7 = arith.mulf %0, %0 : vector<16x512xf32>
    %cst_6 = arith.constant dense<0.000000e+00> : vector<16xf32>
    %8 = vector.multi_reduction <add>, %7, %cst_6 [1] : vector<16x512xf32> to vector<16xf32>
    %9 = vector.shape_cast %8 : vector<16xf32> to vector<16x1xf32>
    %cst_7 = arith.constant 5.120000e+02 : f32
    %10 = vector.broadcast %cst_7 : f32 to vector<16x1xf32>
    %11 = arith.divf %9, %10 : vector<16x1xf32>
    %12 = vector.broadcast %6 : vector<16x1xf32> to vector<16x512xf32>
    %13 = arith.subf %0, %12 : vector<16x512xf32>
    %14 = arith.mulf %6, %6 : vector<16x1xf32>
    %15 = arith.subf %11, %14 : vector<16x1xf32>
    %cst_8 = arith.constant 9.99999974E-6 : f32
    %16 = vector.broadcast %cst_8 : f32 to vector<16x1xf32>
    %17 = arith.addf %15, %16 : vector<16x1xf32>
    %18 = math.rsqrt %17 : vector<16x1xf32>
    %19 = vector.broadcast %18 : vector<16x1xf32> to vector<16x512xf32>
    %20 = arith.mulf %13, %19 : vector<16x512xf32>
    %21 = vector.broadcast %1 : vector<16x1xf32> to vector<16x512xf32>
    %22 = arith.mulf %20, %21 : vector<16x512xf32>
    %23 = vector.broadcast %2 : vector<16x1xf32> to vector<16x512xf32>
    %24 = arith.addf %22, %23 : vector<16x512xf32>
    %c0_9 = arith.constant 0 : index
    %c0_10 = arith.constant 0 : index
    %25 = vector.load %arg1[%c0_9, %c0_10] : memref<8x512xf32, #tpu.memory_space<vmem>>, vector<8x512xf32>
    %c0_11 = arith.constant 0 : index
    %c0_12 = arith.constant 0 : index
    %26 = vector.load %arg5[%c0_11, %c0_12] : memref<8x1xf32, #tpu.memory_space<vmem>>, vector<8x1xf32>
    %c0_13 = arith.constant 0 : index
    %c0_14 = arith.constant 0 : index
    %27 = vector.load %arg6[%c0_13, %c0_14] : memref<8x1xf32, #tpu.memory_space<vmem>>, vector<8x1xf32>
    %cst_15 = arith.constant dense<0.000000e+00> : vector<8xf32>
    %28 = vector.multi_reduction <add>, %25, %cst_15 [1] : vector<8x512xf32> to vector<8xf32>
    %29 = vector.shape_cast %28 : vector<8xf32> to vector<8x1xf32>
    %cst_16 = arith.constant 5.120000e+02 : f32
    %30 = vector.broadcast %cst_16 : f32 to vector<8x1xf32>
    %31 = arith.divf %29, %30 : vector<8x1xf32>
    %32 = arith.mulf %25, %25 : vector<8x512xf32>
    %cst_17 = arith.constant dense<0.000000e+00> : vector<8xf32>
    %33 = vector.multi_reduction <add>, %32, %cst_17 [1] : vector<8x512xf32> to vector<8xf32>
    %34 = vector.shape_cast %33 : vector<8xf32> to vector<8x1xf32>
    %cst_18 = arith.constant 5.120000e+02 : f32
    %35 = vector.broadcast %cst_18 : f32 to vector<8x1xf32>
    %36 = arith.divf %34, %35 : vector<8x1xf32>
    %37 = vector.broadcast %31 : vector<8x1xf32> to vector<8x512xf32>
    %38 = arith.subf %25, %37 : vector<8x512xf32>
    %39 = arith.mulf %31, %31 : vector<8x1xf32>
    %40 = arith.subf %36, %39 : vector<8x1xf32>
    %cst_19 = arith.constant 9.99999974E-6 : f32
    %41 = vector.broadcast %cst_19 : f32 to vector<8x1xf32>
    %42 = arith.addf %40, %41 : vector<8x1xf32>
    %43 = math.rsqrt %42 : vector<8x1xf32>
    %44 = vector.broadcast %43 : vector<8x1xf32> to vector<8x512xf32>
    %45 = arith.mulf %38, %44 : vector<8x512xf32>
    %46 = vector.broadcast %26 : vector<8x1xf32> to vector<8x512xf32>
    %47 = arith.mulf %45, %46 : vector<8x512xf32>
    %48 = vector.broadcast %27 : vector<8x1xf32> to vector<8x512xf32>
    %49 = arith.addf %47, %48 : vector<8x512xf32>
    %c0_20 = arith.constant 0 : index
    %c0_21 = arith.constant 0 : index
    %50 = vector.load %arg2[%c0_20, %c0_21] : memref<9x512xf32, #tpu.memory_space<vmem>>, vector<1x512xf32>
    %c17_i32 = arith.constant 17 : i32
    %51 = tpu.dynamic_rotate %24 by %c17_i32 dim 1 : vector<16x512xf32>, i32 -> vector<16x512xf32>
    %52 = vector.broadcast %50 : vector<1x512xf32> to vector<16x512xf32>
    %53 = arith.mulf %51, %52 : vector<16x512xf32>
    %c17_i32_22 = arith.constant 17 : i32
    %54 = tpu.dynamic_rotate %49 by %c17_i32_22 dim 1 : vector<8x512xf32>, i32 -> vector<8x512xf32>
    %55 = vector.broadcast %50 : vector<1x512xf32> to vector<8x512xf32>
    %56 = arith.mulf %54, %55 : vector<8x512xf32>
    %c0_23 = arith.constant 0 : index
    %c0_24 = arith.constant 0 : index
    %57 = vector.load %arg16[%c0_23, %c0_24] : memref<216x512xf32, #tpu.memory_space<vmem>>, vector<16x512xf32>
    tpu.vector_store %arg16[%c0_23, %c0_24], %53 {strides = array<i32>} : memref<216x512xf32, #tpu.memory_space<vmem>>, vector<16x512xf32>,
    %c16 = arith.constant 16 : index
    %c0_25 = arith.constant 0 : index
    %58 = vector.load %arg16[%c16, %c0_25] : memref<216x512xf32, #tpu.memory_space<vmem>>, vector<8x512xf32>
    tpu.vector_store %arg16[%c16, %c0_25], %56 {strides = array<i32>} : memref<216x512xf32, #tpu.memory_space<vmem>>, vector<8x512xf32>,
    %c1 = arith.constant 1 : index
    %c0_26 = arith.constant 0 : index
    %59 = vector.load %arg2[%c1, %c0_26] : memref<9x512xf32, #tpu.memory_space<vmem>>, vector<1x512xf32>
    %c16_i32 = arith.constant 16 : i32
    %60 = tpu.dynamic_rotate %24 by %c16_i32 dim 1 : vector<16x512xf32>, i32 -> vector<16x512xf32>
    %61 = vector.broadcast %59 : vector<1x512xf32> to vector<16x512xf32>
    %62 = arith.mulf %60, %61 : vector<16x512xf32>
    %c16_i32_27 = arith.constant 16 : i32
    %63 = tpu.dynamic_rotate %49 by %c16_i32_27 dim 1 : vector<8x512xf32>, i32 -> vector<8x512xf32>
    %64 = vector.broadcast %59 : vector<1x512xf32> to vector<8x512xf32>
    %65 = arith.mulf %63, %64 : vector<8x512xf32>
    %c24 = arith.constant 24 : index
    %c0_28 = arith.constant 0 : index
    %66 = vector.load %arg16[%c24, %c0_28] : memref<216x512xf32, #tpu.memory_space<vmem>>, vector<16x512xf32>
    tpu.vector_store %arg16[%c24, %c0_28], %62 {strides = array<i32>} : memref<216x512xf32, #tpu.memory_space<vmem>>, vector<16x512xf32>,
    %c40 = arith.constant 40 : index
    %c0_29 = arith.constant 0 : index
    %67 = vector.load %arg16[%c40, %c0_29] : memref<216x512xf32, #tpu.memory_space<vmem>>, vector<8x512xf32>
    tpu.vector_store %arg16[%c40, %c0_29], %65 {strides = array<i32>} : memref<216x512xf32, #tpu.memory_space<vmem>>, vector<8x512xf32>,
    %c2 = arith.constant 2 : index
    %c0_30 = arith.constant 0 : index
    %68 = vector.load %arg2[%c2, %c0_30] : memref<9x512xf32, #tpu.memory_space<vmem>>, vector<1x512xf32>
    %c15_i32 = arith.constant 15 : i32
    %69 = tpu.dynamic_rotate %24 by %c15_i32 dim 1 : vector<16x512xf32>, i32 -> vector<16x512xf32>
    %70 = vector.broadcast %68 : vector<1x512xf32> to vector<16x512xf32>
    %71 = arith.mulf %69, %70 : vector<16x512xf32>
    %c15_i32_31 = arith.constant 15 : i32
    %72 = tpu.dynamic_rotate %49 by %c15_i32_31 dim 1 : vector<8x512xf32>, i32 -> vector<8x512xf32>
    %73 = vector.broadcast %68 : vector<1x512xf32> to vector<8x512xf32>
    %74 = arith.mulf %72, %73 : vector<8x512xf32>
    %c48 = arith.constant 48 : index
    %c0_32 = arith.constant 0 : index
    %75 = vector.load %arg16[%c48, %c0_32] : memref<216x512xf32, #tpu.memory_space<vmem>>, vector<16x512xf32>
    tpu.vector_store %arg16[%c48, %c0_32], %71 {strides = array<i32>} : memref<216x512xf32, #tpu.memory_space<vmem>>, vector<16x512xf32>,
    %c64 = arith.constant 64 : index
    %c0_33 = arith.constant 0 : index
    %76 = vector.load %arg16[%c64, %c0_33] : memref<216x512xf32, #tpu.memory_space<vmem>>, vector<8x512xf32>
    tpu.vector_store %arg16[%c64, %c0_33], %74 {strides = array<i32>} : memref<216x512xf32, #tpu.memory_space<vmem>>, vector<8x512xf32>,
    %c3 = arith.constant 3 : index
    %c0_34 = arith.constant 0 : index
    %77 = vector.load %arg2[%c3, %c0_34] : memref<9x512xf32, #tpu.memory_space<vmem>>, vector<1x512xf32>
    %c1_i32 = arith.constant 1 : i32
    %78 = tpu.dynamic_rotate %24 by %c1_i32 dim 1 : vector<16x512xf32>, i32 -> vector<16x512xf32>
    %79 = vector.broadcast %77 : vector<1x512xf32> to vector<16x512xf32>
    %80 = arith.mulf %78, %79 : vector<16x512xf32>
    %c1_i32_35 = arith.constant 1 : i32
    %81 = tpu.dynamic_rotate %49 by %c1_i32_35 dim 1 : vector<8x512xf32>, i32 -> vector<8x512xf32>
    %82 = vector.broadcast %77 : vector<1x512xf32> to vector<8x512xf32>
    %83 = arith.mulf %81, %82 : vector<8x512xf32>
    %c72 = arith.constant 72 : index
    %c0_36 = arith.constant 0 : index
    %84 = vector.load %arg16[%c72, %c0_36] : memref<216x512xf32, #tpu.memory_space<vmem>>, vector<16x512xf32>
    tpu.vector_store %arg16[%c72, %c0_36], %80 {strides = array<i32>} : memref<216x512xf32, #tpu.memory_space<vmem>>, vector<16x512xf32>,
    %c88 = arith.constant 88 : index
    %c0_37 = arith.constant 0 : index
    %85 = vector.load %arg16[%c88, %c0_37] : memref<216x512xf32, #tpu.memory_space<vmem>>, vector<8x512xf32>
    tpu.vector_store %arg16[%c88, %c0_37], %83 {strides = array<i32>} : memref<216x512xf32, #tpu.memory_space<vmem>>, vector<8x512xf32>,
    %c96 = arith.constant 96 : index
    %c0_38 = arith.constant 0 : index
    %86 = vector.load %arg16[%c96, %c0_38] : memref<216x512xf32, #tpu.memory_space<vmem>>, vector<16x512xf32>
    tpu.vector_store %arg16[%c96, %c0_38], %24 {strides = array<i32>} : memref<216x512xf32, #tpu.memory_space<vmem>>, vector<16x512xf32>,
    %c112 = arith.constant 112 : index
    %c0_39 = arith.constant 0 : index
    %87 = vector.load %arg16[%c112, %c0_39] : memref<216x512xf32, #tpu.memory_space<vmem>>, vector<8x512xf32>
    tpu.vector_store %arg16[%c112, %c0_39], %49 {strides = array<i32>} : memref<216x512xf32, #tpu.memory_space<vmem>>, vector<8x512xf32>,
    %c5 = arith.constant 5 : index
    %c0_40 = arith.constant 0 : index
    %88 = vector.load %arg2[%c5, %c0_40] : memref<9x512xf32, #tpu.memory_space<vmem>>, vector<1x512xf32>
    %c511_i32 = arith.constant 511 : i32
    %89 = tpu.dynamic_rotate %24 by %c511_i32 dim 1 : vector<16x512xf32>, i32 -> vector<16x512xf32>
    %90 = vector.broadcast %88 : vector<1x512xf32> to vector<16x512xf32>
    %91 = arith.mulf %89, %90 : vector<16x512xf32>
    %c511_i32_41 = arith.constant 511 : i32
    %92 = tpu.dynamic_rotate %49 by %c511_i32_41 dim 1 : vector<8x512xf32>, i32 -> vector<8x512xf32>
    %93 = vector.broadcast %88 : vector<1x512xf32> to vector<8x512xf32>
    %94 = arith.mulf %92, %93 : vector<8x512xf32>
    %c120 = arith.constant 120 : index
    %c0_42 = arith.constant 0 : index
    %95 = vector.load %arg16[%c120, %c0_42] : memref<216x512xf32, #tpu.memory_space<vmem>>, vector<16x512xf32>
    tpu.vector_store %arg16[%c120, %c0_42], %91 {strides = array<i32>} : memref<216x512xf32, #tpu.memory_space<vmem>>, vector<16x512xf32>,
    %c136 = arith.constant 136 : index
    %c0_43 = arith.constant 0 : index
    %96 = vector.load %arg16[%c136, %c0_43] : memref<216x512xf32, #tpu.memory_space<vmem>>, vector<8x512xf32>
    tpu.vector_store %arg16[%c136, %c0_43], %94 {strides = array<i32>} : memref<216x512xf32, #tpu.memory_space<vmem>>, vector<8x512xf32>,
    %c6 = arith.constant 6 : index
    %c0_44 = arith.constant 0 : index
    %97 = vector.load %arg2[%c6, %c0_44] : memref<9x512xf32, #tpu.memory_space<vmem>>, vector<1x512xf32>
    %c497_i32 = arith.constant 497 : i32
    %98 = tpu.dynamic_rotate %24 by %c497_i32 dim 1 : vector<16x512xf32>, i32 -> vector<16x512xf32>
    %99 = vector.broadcast %97 : vector<1x512xf32> to vector<16x512xf32>
    %100 = arith.mulf %98, %99 : vector<16x512xf32>
    %c497_i32_45 = arith.constant 497 : i32
    %101 = tpu.dynamic_rotate %49 by %c497_i32_45 dim 1 : vector<8x512xf32>, i32 -> vector<8x512xf32>
    %102 = vector.broadcast %97 : vector<1x512xf32> to vector<8x512xf32>
    %103 = arith.mulf %101, %102 : vector<8x512xf32>
    %c144 = arith.constant 144 : index
    %c0_46 = arith.constant 0 : index
    %104 = vector.load %arg16[%c144, %c0_46] : memref<216x512xf32, #tpu.memory_space<vmem>>, vector<16x512xf32>
    tpu.vector_store %arg16[%c144, %c0_46], %100 {strides = array<i32>} : memref<216x512xf32, #tpu.memory_space<vmem>>, vector<16x512xf32>,
    %c160 = arith.constant 160 : index
    %c0_47 = arith.constant 0 : index
    %105 = vector.load %arg16[%c160, %c0_47] : memref<216x512xf32, #tpu.memory_space<vmem>>, vector<8x512xf32>
    tpu.vector_store %arg16[%c160, %c0_47], %103 {strides = array<i32>} : memref<216x512xf32, #tpu.memory_space<vmem>>, vector<8x512xf32>,
    %c7 = arith.constant 7 : index
    %c0_48 = arith.constant 0 : index
    %106 = vector.load %arg2[%c7, %c0_48] : memref<9x512xf32, #tpu.memory_space<vmem>>, vector<1x512xf32>
    %c496_i32 = arith.constant 496 : i32
    %107 = tpu.dynamic_rotate %24 by %c496_i32 dim 1 : vector<16x512xf32>, i32 -> vector<16x512xf32>
    %108 = vector.broadcast %106 : vector<1x512xf32> to vector<16x512xf32>
    %109 = arith.mulf %107, %108 : vector<16x512xf32>
    %c496_i32_49 = arith.constant 496 : i32
    %110 = tpu.dynamic_rotate %49 by %c496_i32_49 dim 1 : vector<8x512xf32>, i32 -> vector<8x512xf32>
    %111 = vector.broadcast %106 : vector<1x512xf32> to vector<8x512xf32>
    %112 = arith.mulf %110, %111 : vector<8x512xf32>
    %c168 = arith.constant 168 : index
    %c0_50 = arith.constant 0 : index
    %113 = vector.load %arg16[%c168, %c0_50] : memref<216x512xf32, #tpu.memory_space<vmem>>, vector<16x512xf32>
    tpu.vector_store %arg16[%c168, %c0_50], %109 {strides = array<i32>} : memref<216x512xf32, #tpu.memory_space<vmem>>, vector<16x512xf32>,
    %c184 = arith.constant 184 : index
    %c0_51 = arith.constant 0 : index
    %114 = vector.load %arg16[%c184, %c0_51] : memref<216x512xf32, #tpu.memory_space<vmem>>, vector<8x512xf32>
    tpu.vector_store %arg16[%c184, %c0_51], %112 {strides = array<i32>} : memref<216x512xf32, #tpu.memory_space<vmem>>, vector<8x512xf32>,
    %c8 = arith.constant 8 : index
    %c0_52 = arith.constant 0 : index
    %115 = vector.load %arg2[%c8, %c0_52] : memref<9x512xf32, #tpu.memory_space<vmem>>, vector<1x512xf32>
    %c495_i32 = arith.constant 495 : i32
    %116 = tpu.dynamic_rotate %24 by %c495_i32 dim 1 : vector<16x512xf32>, i32 -> vector<16x512xf32>
    %117 = vector.broadcast %115 : vector<1x512xf32> to vector<16x512xf32>
    %118 = arith.mulf %116, %117 : vector<16x512xf32>
    %c495_i32_53 = arith.constant 495 : i32
    %119 = tpu.dynamic_rotate %49 by %c495_i32_53 dim 1 : vector<8x512xf32>, i32 -> vector<8x512xf32>
    %120 = vector.broadcast %115 : vector<1x512xf32> to vector<8x512xf32>
    %121 = arith.mulf %119, %120 : vector<8x512xf32>
    %c192 = arith.constant 192 : index
    %c0_54 = arith.constant 0 : index
    %122 = vector.load %arg16[%c192, %c0_54] : memref<216x512xf32, #tpu.memory_space<vmem>>, vector<16x512xf32>
    tpu.vector_store %arg16[%c192, %c0_54], %118 {strides = array<i32>} : memref<216x512xf32, #tpu.memory_space<vmem>>, vector<16x512xf32>,
    %c208 = arith.constant 208 : index
    %c0_55 = arith.constant 0 : index
    %123 = vector.load %arg16[%c208, %c0_55] : memref<216x512xf32, #tpu.memory_space<vmem>>, vector<8x512xf32>
    tpu.vector_store %arg16[%c208, %c0_55], %121 {strides = array<i32>} : memref<216x512xf32, #tpu.memory_space<vmem>>, vector<8x512xf32>,
    %c0_56 = arith.constant 0 : index
    %c0_57 = arith.constant 0 : index
    %124 = vector.load %arg7[%c0_56, %c0_57] : memref<16x216xf32, #tpu.memory_space<vmem>>, vector<16x216xf32>
    %c0_58 = arith.constant 0 : index
    %c0_59 = arith.constant 0 : index
    %125 = vector.load %arg16[%c0_58, %c0_59] : memref<216x512xf32, #tpu.memory_space<vmem>>, vector<216x512xf32>
    %cst_60 = arith.constant dense<0.000000e+00> : vector<16x512xf32>
    %126 = tpu.matmul %124, %125, %cst_60 {dimension_numbers = #tpu.dot_dimension_numbers<[1], [0], [0], [1], [0, 0, 1, 1], [], []>} : vector<16x216xf32>, vector<216x512xf32>, vector<16x512xf32> -> vector<16x512xf32>
    %c0_61 = arith.constant 0 : index
    %c0_62 = arith.constant 0 : index
    %127 = vector.load %arg8[%c0_61, %c0_62] : memref<16x1xf32, #tpu.memory_space<vmem>>, vector<16x1xf32>
    %128 = vector.broadcast %127 : vector<16x1xf32> to vector<16x512xf32>
    %129 = arith.addf %126, %128 : vector<16x512xf32>
    %c0_63 = arith.constant 0 : index
    %c0_64 = arith.constant 0 : index
    %130 = vector.load %arg9[%c0_63, %c0_64] : memref<16x1xf32, #tpu.memory_space<vmem>>, vector<16x1xf32>
    %c0_65 = arith.constant 0 : index
    %c0_66 = arith.constant 0 : index
    %131 = vector.load %arg10[%c0_65, %c0_66] : memref<16x1xf32, #tpu.memory_space<vmem>>, vector<16x1xf32>
    %cst_67 = arith.constant dense<0.000000e+00> : vector<16xf32>
    %132 = vector.multi_reduction <add>, %129, %cst_67 [1] : vector<16x512xf32> to vector<16xf32>
    %133 = vector.shape_cast %132 : vector<16xf32> to vector<16x1xf32>
    %cst_68 = arith.constant 5.120000e+02 : f32
    %134 = vector.broadcast %cst_68 : f32 to vector<16x1xf32>
    %135 = arith.divf %133, %134 : vector<16x1xf32>
    %136 = arith.mulf %129, %129 : vector<16x512xf32>
    %cst_69 = arith.constant dense<0.000000e+00> : vector<16xf32>
    %137 = vector.multi_reduction <add>, %136, %cst_69 [1] : vector<16x512xf32> to vector<16xf32>
    %138 = vector.shape_cast %137 : vector<16xf32> to vector<16x1xf32>
    %cst_70 = arith.constant 5.120000e+02 : f32
    %139 = vector.broadcast %cst_70 : f32 to vector<16x1xf32>
    %140 = arith.divf %138, %139 : vector<16x1xf32>
    %141 = vector.broadcast %135 : vector<16x1xf32> to vector<16x512xf32>
    %142 = arith.subf %129, %141 : vector<16x512xf32>
    %143 = arith.mulf %135, %135 : vector<16x1xf32>
    %144 = arith.subf %140, %143 : vector<16x1xf32>
    %cst_71 = arith.constant 9.99999974E-6 : f32
    %145 = vector.broadcast %cst_71 : f32 to vector<16x1xf32>
    %146 = arith.addf %144, %145 : vector<16x1xf32>
    %147 = math.rsqrt %146 : vector<16x1xf32>
    %148 = vector.broadcast %147 : vector<16x1xf32> to vector<16x512xf32>
    %149 = arith.mulf %142, %148 : vector<16x512xf32>
    %150 = vector.broadcast %130 : vector<16x1xf32> to vector<16x512xf32>
    %151 = arith.mulf %149, %150 : vector<16x512xf32>
    %152 = vector.broadcast %131 : vector<16x1xf32> to vector<16x512xf32>
    %153 = arith.addf %151, %152 : vector<16x512xf32>
    %cst_72 = arith.constant 0.000000e+00 : f32
    %154 = vector.broadcast %cst_72 : f32 to vector<16x512xf32>
    %155 = arith.maximumf %153, %154 : vector<16x512xf32>
    %c0_73 = arith.constant 0 : index
    %c0_74 = arith.constant 0 : index
    %156 = vector.load %arg11[%c0_73, %c0_74] : memref<16x16xf32, #tpu.memory_space<vmem>>, vector<16x16xf32>
    %cst_75 = arith.constant dense<0.000000e+00> : vector<16x512xf32>
    %157 = tpu.matmul %156, %155, %cst_75 {dimension_numbers = #tpu.dot_dimension_numbers<[1], [0], [0], [1], [0, 0, 1, 1], [], []>} : vector<16x16xf32>, vector<16x512xf32>, vector<16x512xf32> -> vector<16x512xf32>
    %c0_76 = arith.constant 0 : index
    %c0_77 = arith.constant 0 : index
    %158 = vector.load %arg12[%c0_76, %c0_77] : memref<16x1xf32, #tpu.memory_space<vmem>>, vector<16x1xf32>
    %159 = vector.broadcast %158 : vector<16x1xf32> to vector<16x512xf32>
    %160 = arith.addf %157, %159 : vector<16x512xf32>
    %c0_78 = arith.constant 0 : index
    %c0_79 = arith.constant 0 : index
    %161 = vector.load %arg13[%c0_78, %c0_79] : memref<16x1xf32, #tpu.memory_space<vmem>>, vector<16x1xf32>
    %c0_80 = arith.constant 0 : index
    %c0_81 = arith.constant 0 : index
    %162 = vector.load %arg14[%c0_80, %c0_81] : memref<16x1xf32, #tpu.memory_space<vmem>>, vector<16x1xf32>
    %cst_82 = arith.constant dense<0.000000e+00> : vector<16xf32>
    %163 = vector.multi_reduction <add>, %160, %cst_82 [1] : vector<16x512xf32> to vector<16xf32>
    %164 = vector.shape_cast %163 : vector<16xf32> to vector<16x1xf32>
    %cst_83 = arith.constant 5.120000e+02 : f32
    %165 = vector.broadcast %cst_83 : f32 to vector<16x1xf32>
    %166 = arith.divf %164, %165 : vector<16x1xf32>
    %167 = arith.mulf %160, %160 : vector<16x512xf32>
    %cst_84 = arith.constant dense<0.000000e+00> : vector<16xf32>
    %168 = vector.multi_reduction <add>, %167, %cst_84 [1] : vector<16x512xf32> to vector<16xf32>
    %169 = vector.shape_cast %168 : vector<16xf32> to vector<16x1xf32>
    %cst_85 = arith.constant 5.120000e+02 : f32
    %170 = vector.broadcast %cst_85 : f32 to vector<16x1xf32>
    %171 = arith.divf %169, %170 : vector<16x1xf32>
    %172 = vector.broadcast %166 : vector<16x1xf32> to vector<16x512xf32>
    %173 = arith.subf %160, %172 : vector<16x512xf32>
    %174 = arith.mulf %166, %166 : vector<16x1xf32>
    %175 = arith.subf %171, %174 : vector<16x1xf32>
    %cst_86 = arith.constant 9.99999974E-6 : f32
    %176 = vector.broadcast %cst_86 : f32 to vector<16x1xf32>
    %177 = arith.addf %175, %176 : vector<16x1xf32>
    %178 = math.rsqrt %177 : vector<16x1xf32>
    %179 = vector.broadcast %178 : vector<16x1xf32> to vector<16x512xf32>
    %180 = arith.mulf %173, %179 : vector<16x512xf32>
    %181 = vector.broadcast %161 : vector<16x1xf32> to vector<16x512xf32>
    %182 = arith.mulf %180, %181 : vector<16x512xf32>
    %183 = vector.broadcast %162 : vector<16x1xf32> to vector<16x512xf32>
    %184 = arith.addf %182, %183 : vector<16x512xf32>
    %cst_87 = arith.constant 0.000000e+00 : f32
    %185 = vector.broadcast %cst_87 : f32 to vector<16x512xf32>
    %186 = arith.maximumf %184, %185 : vector<16x512xf32>
    %c0_88 = arith.constant 0 : index
    %c0_89 = arith.constant 0 : index
    %187 = vector.load %arg15[%c0_88, %c0_89] : memref<16x512xf32, #tpu.memory_space<vmem>>, vector<16x512xf32>
    tpu.vector_store %arg15[%c0_88, %c0_89], %186 {strides = array<i32>} : memref<16x512xf32, #tpu.memory_space<vmem>>, vector<16x512xf32>,
    return
  }
}

</mosaic_0001>

<bundles_post_ra>
// kernel: up_block_pallas.1
= control target key start
LH: loop header
LB: loop body
LE: loop exit
PB: predicated region body
PF: predicated region fallthrough
CT: control target
= control target key end

     0   :  { %v1725_v3 = vmov 0   ;;  %s1730_s21 = smov 127   ;;  %s1731_s24 = smov 113   ;;  %vm1016_vm3 = vcmask 719872   ;;  %vm1295_vm9 = vcmask 130048   ;;  %s2599_s0 = inlined_call_operand.vmem [shape: f32[16,512], index: 0, kind: input, shape index: {}]   ;;  %s2600_s1 = inlined_call_operand.vmem [shape: f32[8,512], index: 1, kind: input, shape index: {}]   ;;  %s2601_s3 = inlined_call_operand.vmem [shape: f32[16,1], index: 3, kind: input, shape index: {}]   ;;  %s2602_s4 = inlined_call_operand.vmem [shape: f32[16,1], index: 4, kind: input, shape index: {}]   ;;  %s2603_s5 = inlined_call_operand.vmem [shape: f32[8,1], index: 5, kind: input, shape index: {}]   ;;  %s2604_s6 = inlined_call_operand.vmem [shape: f32[8,1], index: 6, kind: input, shape index: {}]   ;;  %s2605_s2 = inlined_call_operand.vmem [shape: f32[9,512], index: 2, kind: input, shape index: {}]   ;;  %s2606_s7 = inlined_call_operand.vmem [shape: f32[16,216], index: 7, kind: input, shape index: {}]   ;;  %s2607_s8 = inlined_call_operand.vmem [shape: f32[16,1], index: 8, kind: input, shape index: {}]   ;;  %s2608_s9 = inlined_call_operand.vmem [shape: f32[16,1], index: 9, kind: input, shape index: {}]   ;;  %s2609_s10 = inlined_call_operand.vmem [shape: f32[16,1], index: 10, kind: input, shape index: {}]   ;;  %s2610_s12 = inlined_call_operand.vmem [shape: f32[16,1], index: 12, kind: input, shape index: {}]   ;;  %s2611_s13 = inlined_call_operand.vmem [shape: f32[16,1], index: 13, kind: input, shape index: {}]   ;;  %s2612_s11 = inlined_call_operand.vmem [shape: f32[16,16], index: 11, kind: input, shape index: {}]   ;;  %s2613_s14 = inlined_call_operand.vmem [shape: f32[16,1], index: 14, kind: input, shape index: {}]   ;;  %s2614_s15 = inlined_call_operand.vmem [shape: f32[16,512], index: 15, kind: output, shape index: {}]  }
   0x1   :  { %v1818_v0 = vld [vmem:[%s2599_s0] sm:$0xff]  ;;  %v1823_v1 = vld [vmem:[%s2599_s0 + $0x8] sm:$0xff]  ;;  %v1828_v2 = vld [vmem:[%s2599_s0 + $0x10] sm:$0xff]  ;;  %1710 = vset.pattern.permute.xlu1 %v1725_v3  ;;  %1709 = vset.pattern.permute.xlu0 %v1725_v3  ;;  %s1732_s26 = smov 112   ;;  %s1733_s29 = smov 111  }
   0x2   :  { %v1833_v4 = vld [vmem:[%s2599_s0 + $0x18] sm:$0xff]  ;;  %v62_v5 = vadd.f32 %v1823_v1, %v1818_v0  ;;  %v75_v6 = vmul.f32 %v1818_v0, %v1818_v0  ;;  %v76_v7 = vmul.f32 %v1823_v1, %v1823_v1  ;;  %v77_v8 = vmul.f32 %v1828_v2, %v1828_v2  ;;  %v1846_v9 = vld [vmem:[%s2599_s0 + $0x20] sm:$0xff]  ;;  %v1851_v10 = vld [vmem:[%s2599_s0 + $0x28] sm:$0xff] }
   0x3   :  { %v78_v11 = vmul.f32 %v1833_v4, %v1833_v4  ;;  %v1858_v12 = vld [vmem:[%s2599_s0 + $0x30] sm:$0xff]  ;;  %v1863_v13 = vld [vmem:[%s2599_s0 + $0x38] sm:$0xff]  ;;  %v67_v14 = vadd.f32 %v1851_v10, %v1846_v9  ;;  %v79_v15 = vmul.f32 %v1846_v9, %v1846_v9  ;;  %v80_v16 = vmul.f32 %v1851_v10, %v1851_v10  ;;  %v1874_v17 = vld [vmem:[%s2600_s1] sm:$0xff] }
   0x4   :  { %v63_v18 = vadd.f32 %v62_v5, %v1828_v2  ;;  %v83_v19 = vadd.f32 %v76_v7, %v75_v6  ;;  %v81_v20 = vmul.f32 %v1858_v12, %v1858_v12  ;;  %v82_v21 = vmul.f32 %v1863_v13, %v1863_v13  ;;  %v1884_v22 = vld [vmem:[%s2600_s1 + $0x8] sm:$0xff]  ;;  %v1889_v23 = vld [vmem:[%s2600_s1 + $0x10] sm:$0xff]  ;;  %v1904_v33 = vld [vmem:[%s2600_s1 + $0x18] sm:$0xff] }
   0x5   :  { %v68_v24 = vadd.f32 %v67_v14, %v1858_v12  ;;  %v88_v25 = vadd.f32 %v80_v16, %v79_v15  ;;  %v161_v26 = vadd.f32 %v1884_v22, %v1874_v17  ;;  %v167_v27 = vmul.f32 %v1874_v17, %v1874_v17  ;;  %v59_v43 = vld [vmem:[%s2601_s3 + $0x8] sm:$0xff]  ;;  %v58_v44 = vld [vmem:[%s2601_s3] sm:$0xff]  ;;  %s1726_s3 = smov 17  }
   0x6   :  { %v64_v28 = vadd.f32 %v63_v18, %v1833_v4  ;;  %v84_v29 = vadd.f32 %v83_v19, %v77_v8  ;;  %v168_v30 = vmul.f32 %v1884_v22, %v1884_v22  ;;  %v169_v31 = vmul.f32 %v1889_v23, %v1889_v23  ;;  %v60_v45 = vld [vmem:[%s2602_s4] sm:$0xff]  ;;  %v61_v46 = vld [vmem:[%s2602_s4 + $0x8] sm:$0xff]  ;;  %s1727_s4 = smov 16  }
   0x7   :  { %v89_v32 = vadd.f32 %v88_v25, %v81_v20  ;;  %v69_v35 = vadd.f32 %v68_v24, %v1863_v13  ;;  %v162_v36 = vadd.f32 %v161_v26, %v1889_v23  ;;  %v170_v39 = vmul.f32 %v1904_v33, %v1904_v33  ;;  %v159_v47 = vld [vmem:[%s2603_s5] sm:$0xff]  ;;  %s1728_s5 = smov 15  }
   0x8   :  { %65 = vadd.xlane.f32.xlu0 %v64_v28  ;;  %v85_v34 = vadd.f32 %v84_v29, %v78_v11  ;;  %v171_v37 = vadd.f32 %v168_v30, %v167_v27  ;;  %v160_v48 = vld [vmem:[%s2604_s6] sm:$0xff]  ;;  %s1729_s6 = smov 1  }
   0x9   :  { %v90_v38 = vadd.f32 %v89_v32, %v82_v21  ;;  %v163_v41 = vadd.f32 %v162_v36, %v1904_v33 }
   0xa   :  { %86 = vadd.xlane.f32.xlu1 %v85_v34  ;;  %v172_v40 = vadd.f32 %v171_v37, %v169_v31 }
   0xc   :  { %70 = vadd.xlane.f32.xlu0 %v69_v35  ;;  %v173_v42 = vadd.f32 %v172_v40, %v170_v39 }
   0xe   :  { %91 = vadd.xlane.f32.xlu1 %v90_v38 }
  0x10   :  { %164 = vadd.xlane.f32.xlu0 %v163_v41 }
  0x12   :  { %174 = vadd.xlane.f32.xlu1 %v173_v42 }
  0x23   :  { %126 = vperm.xlu1 %1710, %v59_v43  }
  0x26   :  { %121 = vperm.xlu0 %1709, %v58_v44  }
  0x27   :  { %139 = vperm.xlu1 %1710, %v60_v45  }
  0x2b   :  { %144 = vperm.xlu1 %1710, %v61_v46  }
  0x2f   :  { %191 = vperm.xlu1 %1710, %v159_v47  }
  0x33   :  { %200 = vperm.xlu1 %1710, %v160_v48  }
  0x95   :  { %v66_v49 = vpop.xlane.xlu0 %65 }
  0x96   :  { %v1929_v50 = vmul.f32 0.001953125, %v66_v49 }
  0x97   :  { %v87_v51 = vpop.xlane.xlu1 %86 }
  0x98   :  { %v93_v52 = vmul.f32 0.001953125, %v87_v51  ;;  %v103_v53 = vmul.f32 %v1929_v50, %v1929_v50  ;;  %v95_v15 = vsub.f32 %v1818_v0, %v1929_v50  ;;  %v96_v28 = vsub.f32 %v1823_v1, %v1929_v50 }
  0x99   :  { %v71_v54 = vpop.xlane.xlu0 %70 }
  0x9a   :  { %v105_v55 = vsub.f32 %v93_v52, %v103_v53  ;;  %v74_v56 = vmul.f32 0.001953125, %v71_v54 }
  0x9b   :  { %v92_v57 = vpop.xlane.xlu1 %91 }
  0x9c   :  { %v107_v58 = vadd.f32 1e-05, %v105_v55  ;;  %v94_v59 = vmul.f32 0.001953125, %v92_v57  ;;  %v104_v60 = vmul.f32 %v74_v56, %v74_v56  ;;  %v99_v21 = vsub.f32 %v1846_v9, %v74_v56 }
  0x9d   :  { %v165_v61 = vpop.xlane.xlu0 %164  ;;  %v100_v24 = vsub.f32 %v1851_v10, %v74_v56  ;;  %v102_v25 = vsub.f32 %v1863_v13, %v74_v56  ;;  %v101_v35 = vsub.f32 %v1858_v12, %v74_v56  ;;  %v98_v10 = vsub.f32 %v1833_v4, %v1929_v50 }
  0x9e   :  { %1711 = vrsqrt.f32 %v107_v58  ;;  %v106_v62 = vsub.f32 %v94_v59, %v104_v60  ;;  %v1933_v63 = vmul.f32 0.001953125, %v165_v61  ;;  %v97_v4 = vsub.f32 %v1828_v2, %v1929_v50 }
  0x9f   :  { %v175_v3 = vpop.xlane.xlu1 %174 }
  0xa0   :  { %v108_v5 = vadd.f32 1e-05, %v106_v62  ;;  %v176_v6 = vmul.f32 0.001953125, %v175_v3  ;;  %v181_v7 = vmul.f32 %v1933_v63, %v1933_v63  ;;  %v178_v12 = vsub.f32 %v1884_v22, %v1933_v63 }
  0xa1   :  { %v177_v22 = vsub.f32 %v1874_v17, %v1933_v63  ;;  %v180_v56 = vsub.f32 %v1904_v33, %v1933_v63  ;;  %v179_v59 = vsub.f32 %v1889_v23, %v1933_v63  ;;  %v224_v23 = vlaneseq }
  0xa2   :  { %1713 = vrsqrt.f32 %v108_v5  ;;  %v182_v8 = vsub.f32 %v176_v6, %v181_v7 }
  0xa3   :  { %v127_v11 = vpop.permute.xlu1 %126  ;;  %v237_v63 = vshrl.u32 %v224_v23, 7  ;;  %v2050_v6 = vand.u32 127, %v224_v23 }
  0xa4   :  { %v183_v14 = vadd.f32 1e-05, %v182_v8 }
  0xa5   :  { %v122_v19 = vpop.permute.xlu0 %121  ;;  %v2054_v7 = vsub.s32 1, %v237_v63  ;;  %vm226_vm0 = vcmp.lt.s32.totalorder %v2050_v6, 17  ;;  %vm310_vm1 = vcmp.lt.s32.totalorder %v2050_v6, 16  ;;  %vm394_vm2 = vcmp.lt.s32.totalorder %v2050_v6, 15 }
  0xa6   :  { %1715 = vrsqrt.f32 %v183_v14  ;;  %vm478_vm4 = vcmp.lt.s32.totalorder %v2050_v6, 1  ;;  %vm574_vm5 = vcmp.lt.s32.totalorder %v2050_v6, 127  ;;  %vm658_vm6 = vcmp.lt.s32.totalorder %v2050_v6, 113 }
  0xa7   :  { %v140_v18 = vpop.permute.xlu1 %139  ;;  %vm742_vm7 = vcmp.lt.s32.totalorder %v2050_v6, 112  ;;  %vm826_vm8 = vcmp.lt.s32.totalorder %v2050_v6, 111  ;;  %v894_v6 = vld [vmem:[%s2606_s7 + $0x10] sm:$0xff] }
  0xa8   :  { %v1712_v16 = vpop.eup %1711 }
  0xa9   :  { %v111_v20 = vmul.f32 %v1712_v16, %v95_v15  ;;  %v112_v0 = vmul.f32 %v1712_v16, %v96_v28  ;;  %v114_v40 = vmul.f32 %v1712_v16, %v98_v10  ;;  %v113_v46 = vmul.f32 %v1712_v16, %v97_v4 }
  0xaa   :  { %v2064_v16 = vsub.s32 0, %v237_v63 }
  0xab   :  { %v129_v26 = vmul.f32 %v122_v19, %v111_v20  ;;  %v145_v34 = vpop.permute.xlu1 %144  ;;  %v130_v41 = vmul.f32 %v122_v19, %v112_v0  ;;  %v132_v47 = vmul.f32 %v122_v19, %v114_v40  ;;  %v131_v50 = vmul.f32 %v122_v19, %v113_v46 }
  0xac   :  { %v1714_v27 = vpop.eup %1713 }
  0xad   :  { %v115_v29 = vmul.f32 %v1714_v27, %v99_v21  ;;  %v116_v30 = vmul.f32 %v1714_v27, %v100_v24  ;;  %v118_v31 = vmul.f32 %v1714_v27, %v102_v25  ;;  %v1944_v32 = vadd.f32 %v140_v18, %v129_v26 }
  0xae   :  { %v117_v13 = vmul.f32 %v1714_v27, %v101_v35  ;;  %v1965_v48 = vadd.f32 %v140_v18, %v130_v41  ;;  %v1975_v51 = vadd.f32 %v140_v18, %v132_v47  ;;  %v1983_v17 = vadd.f32 %v140_v18, %v131_v50 }
  0xaf   :  { %v133_v36 = vmul.f32 %v127_v11, %v115_v29  ;;  %v134_v9 = vmul.f32 %v127_v11, %v116_v30  ;;  %208 = vrot.lane.b32.xlu1 %v1944_v32, %s1726_s3  ;;  %v136_v1 = vmul.f32 %v127_v11, %v118_v31  ;;  %v192_v42 = vpop.permute.xlu1 %191  ;;  %v2072_v24 = vsub.s32 3, %v237_v63 }
  0xb0   :  { %v1716_v39 = vpop.eup %1715  ;;  %v135_v43 = vmul.f32 %v127_v11, %v117_v13  ;;  %v207_v11 = vld [vmem:[%s2605_s2] ss:$8 sm:$0xf]  ;;  %v2074_v25 = vsub.s32 2, %v237_v63 }
  0xb1   :  { %v1951_v37 = vadd.f32 %v145_v34, %v133_v36  ;;  %v1953_v38 = vadd.f32 %v145_v34, %v134_v9  ;;  %v1963_v44 = vadd.f32 %v145_v34, %v136_v1  ;;  %v186_v45 = vmul.f32 %v1716_v39, %v178_v12 }
  0xb2   :  { %v1973_v2 = vadd.f32 %v145_v34, %v135_v43  ;;  %v185_v52 = vmul.f32 %v1716_v39, %v177_v22  ;;  %v188_v57 = vmul.f32 %v1716_v39, %v180_v56  ;;  %v187_v60 = vmul.f32 %v1716_v39, %v179_v59  ;;  %v1572_v22 = vld [vmem:[%s2605_s2 + $0x1] ss:$8 sm:$0xf] }
  0xb3   :  { %214 = vrot.lane.b32.xlu0 %v1953_v38, %s1726_s3  ;;  %210 = vrot.lane.b32.xlu1 %v1951_v37, %s1726_s3  ;;  %v195_v49 = vmul.f32 %v192_v42, %v186_v45  ;;  %v201_v53 = vpop.permute.xlu1 %200  ;;  %v243_v15 = vrot.slane %v207_v11, %v2054_v7  ;;  %v239_v28 = vrot.slane %v207_v11, %v2064_v16 }
  0xb4   :  { %v194_v55 = vmul.f32 %v192_v42, %v185_v52  ;;  %v197_v61 = vmul.f32 %v192_v42, %v188_v57  ;;  %v196_v33 = vmul.f32 %v192_v42, %v187_v60  ;;  %v2086_v35 = vrot.slane %v207_v11, %v2072_v24 }
  0xb5   :  { %v1981_v54 = vadd.f32 %v201_v53, %v195_v49  ;;  %v247_v36 = vrot.slane %v207_v11, %v2074_v25 }
  0xb6   :  { %v1991_v58 = vadd.f32 %v201_v53, %v194_v55  ;;  %v2000_v62 = vadd.f32 %v201_v53, %v197_v61  ;;  %v2005_v3 = vadd.f32 %v201_v53, %v196_v33  ;;  %v327_v53 = vrot.slane %v1572_v22, %v2054_v7 }
  0xb7   :  { %222 = vrot.lane.b32.xlu0 %v1963_v44, %s1726_s3  ;;  %212 = vrot.lane.b32.xlu1 %v1965_v48, %s1726_s3  ;;  %v323_v33 = vrot.slane %v1572_v22, %v2064_v16 }
  0xbb   :  { %218 = vrot.lane.b32.xlu0 %v1973_v2, %s1726_s3  ;;  %220 = vrot.lane.b32.xlu1 %v1975_v51, %s1726_s3 }
  0xbf   :  { %266 = vrot.lane.b32.xlu0 %v1981_v54, %s1726_s3  ;;  %216 = vrot.lane.b32.xlu1 %v1983_v17, %s1726_s3 }
  0xc3   :  { %298 = vrot.lane.b32.xlu0 %v1965_v48, %s1727_s4  ;;  %264 = vrot.lane.b32.xlu1 %v1991_v58, %s1726_s3 }
  0xc7   :  { %306 = vrot.lane.b32.xlu0 %v1975_v51, %s1727_s4  ;;  %294 = vrot.lane.b32.xlu1 %v1944_v32, %s1727_s4 }
  0xcb   :  { %302 = vrot.lane.b32.xlu0 %v1983_v17, %s1727_s4  ;;  %270 = vrot.lane.b32.xlu1 %v2000_v62, %s1726_s3 }
  0xcf   :  { %300 = vrot.lane.b32.xlu0 %v1953_v38, %s1727_s4  ;;  %268 = vrot.lane.b32.xlu1 %v2005_v3, %s1726_s3 }
  0xd3   :  { %350 = vrot.lane.b32.xlu0 %v1981_v54, %s1727_s4  ;;  %296 = vrot.lane.b32.xlu1 %v1951_v37, %s1727_s4 }
  0xd7   :  { %354 = vrot.lane.b32.xlu0 %v2000_v62, %s1727_s4  ;;  %348 = vrot.lane.b32.xlu1 %v1991_v58, %s1727_s4 }
  0xdb   :  { %352 = vrot.lane.b32.xlu0 %v2005_v3, %s1727_s4  ;;  %308 = vrot.lane.b32.xlu1 %v1963_v44, %s1727_s4 }
  0xdf   :  { %380 = vrot.lane.b32.xlu0 %v1951_v37, %s1728_s5  ;;  %304 = vrot.lane.b32.xlu1 %v1973_v2, %s1727_s4 }
  0xe3   :  { %384 = vrot.lane.b32.xlu0 %v1953_v38, %s1728_s5  ;;  %378 = vrot.lane.b32.xlu1 %v1944_v32, %s1728_s5 }
  0xe7   :  { %392 = vrot.lane.b32.xlu0 %v1963_v44, %s1728_s5  ;;  %382 = vrot.lane.b32.xlu1 %v1965_v48, %s1728_s5 }
  0xeb   :  { %388 = vrot.lane.b32.xlu0 %v1973_v2, %s1728_s5  ;;  %390 = vrot.lane.b32.xlu1 %v1975_v51, %s1728_s5 }
  0xef   :  { %434 = vrot.lane.b32.xlu0 %v1981_v54, %s1728_s5  ;;  %386 = vrot.lane.b32.xlu1 %v1983_v17, %s1728_s5 }
  0xf3   :  { %466 = vrot.lane.b32.xlu0 %v1965_v48, %s1729_s6  ;;  %432 = vrot.lane.b32.xlu1 %v1991_v58, %s1728_s5 }
  0xf7   :  { %474 = vrot.lane.b32.xlu0 %v1975_v51, %s1729_s6  ;;  %462 = vrot.lane.b32.xlu1 %v1944_v32, %s1729_s6 }
  0xfb   :  { %470 = vrot.lane.b32.xlu0 %v1983_v17, %s1729_s6  ;;  %438 = vrot.lane.b32.xlu1 %v2000_v62, %s1728_s5 }
  0xff   :  { %468 = vrot.lane.b32.xlu0 %v1953_v38, %s1729_s6  ;;  %436 = vrot.lane.b32.xlu1 %v2005_v3, %s1728_s5 }
 0x103   :  { %518 = vrot.lane.b32.xlu0 %v1981_v54, %s1729_s6  ;;  %464 = vrot.lane.b32.xlu1 %v1951_v37, %s1729_s6 }
 0x107   :  { %522 = vrot.lane.b32.xlu0 %v2000_v62, %s1729_s6  ;;  %516 = vrot.lane.b32.xlu1 %v1991_v58, %s1729_s6 }
 0x10b   :  { %520 = vrot.lane.b32.xlu0 %v2005_v3, %s1729_s6  ;;  %476 = vrot.lane.b32.xlu1 %v1963_v44, %s1729_s6 }
 0x10f   :  { %566 = vrot.lane.b32.xlu0 %v1983_v17, %s1730_s21  ;;  %472 = vrot.lane.b32.xlu1 %v1973_v2, %s1729_s6 }
 0x113   :  { %570 = vrot.lane.b32.xlu0 %v1975_v51, %s1730_s21  ;;  %562 = vrot.lane.b32.xlu1 %v1965_v48, %s1730_s21 }
 0x117   :  { %568 = vrot.lane.b32.xlu0 %v1973_v2, %s1730_s21  ;;  %558 = vrot.lane.b32.xlu1 %v1944_v32, %s1730_s21 }
 0x11b   :  { %616 = vrot.lane.b32.xlu0 %v2005_v3, %s1730_s21  ;;  %564 = vrot.lane.b32.xlu1 %v1953_v38, %s1730_s21 }
 0x11f   :  { %612 = vrot.lane.b32.xlu0 %v1991_v58, %s1730_s21  ;;  %614 = vrot.lane.b32.xlu1 %v1981_v54, %s1730_s21 }
 0x121   :  { %v209_v5 = vpop.permute.xlu1 %208 }
 0x123   :  { %618 = vrot.lane.b32.xlu0 %v2000_v62, %s1730_s21  ;;  %560 = vrot.lane.b32.xlu1 %v1951_v37, %s1730_s21 }
 0x125   :  { %v215_v8 = vpop.permute.xlu0 %214  ;;  %v211_v14 = vpop.permute.xlu1 %210 }
 0x126   :  { %v232_v19 = vsel %vm226_vm0, %v211_v14, %v215_v8 }
 0x127   :  { %648 = vrot.lane.b32.xlu0 %v1953_v38, %s1731_s24  ;;  %572 = vrot.lane.b32.xlu1 %v1963_v44, %s1730_s21  ;;  %v261_v27 = vmul.f32 %v243_v15, %v232_v19 }
 0x129   :  { %v223_v18 = vpop.permute.xlu0 %222  ;;  %v213_v20 = vpop.permute.xlu1 %212 }
 0x12a   :  { %v231_v21 = vsel %vm226_vm0, %v209_v5, %v213_v20  ;;  %v234_v29 = vsel %vm226_vm0, %v223_v18, %v211_v14  ;;  %v331_v14 = vrot.slane %v1572_v22, %v2074_v25 }
 0x12b   :  { %652 = vrot.lane.b32.xlu0 %v1973_v2, %s1731_s24  ;;  %646 = vrot.lane.b32.xlu1 %v1965_v48, %s1731_s24  ;;  %v257_v26 = vmul.f32 %v243_v15, %v231_v21  ;;  %v260_v10 = vmul.f32 %v239_v28, %v234_v29 }
 0x12d   :  { %v219_v30 = vpop.permute.xlu0 %218  ;;  %v221_v31 = vpop.permute.xlu1 %220  ;;  %v1587_v0 = vpack.c.bf16 %v261_v27, %v257_v26 }
 0x12e   :  { %v233_v34 = vsel %vm226_vm0, %v221_v31, %v209_v5  ;;  %v228_v13 = vsel %vm226_vm0, %v219_v30, %v223_v18  ;;  %v230_v1 = vsel %vm226_vm0, %v215_v8, %v219_v30  ;;  %v335_v18 = vrot.slane %v1572_v22, %v2072_v24 }
 0x12f   :  { %644 = vrot.lane.b32.xlu0 %v1951_v37, %s1731_s24  ;;  %650 = vrot.lane.b32.xlu1 %v1983_v17, %s1731_s24  ;;  %v256_v9 = vmul.f32 %v239_v28, %v233_v34  ;;  %v263_v42 = vmul.f32 %v2086_v35, %v228_v13  ;;  %v262_v46 = vmul.f32 %v247_v36, %v230_v1 }
 0x130   :  { %1588 = vmatprep.subr.bf16.mxu0 %v1587_v0 }
 0x131   :  { %v267_v39 = vpop.permute.xlu0 %266  ;;  %v217_v40 = vpop.permute.xlu1 %216  ;;  %v1589_v41 = vpack.c.bf16 %v260_v10, %v256_v9 }
 0x132   :  { %v229_v12 = vsel %vm226_vm0, %v213_v20, %v217_v40  ;;  %v227_v4 = vsel %vm226_vm0, %v217_v40, %v221_v31 }
 0x133   :  { %656 = vrot.lane.b32.xlu0 %v1963_v44, %s1731_s24  ;;  %642 = vrot.lane.b32.xlu1 %v1944_v32, %s1731_s24  ;;  %v259_v43 = vmul.f32 %v2086_v35, %v227_v4  ;;  %v258_v45 = vmul.f32 %v247_v36, %v229_v12 }
 0x134   :  { %1590 = vmatpush1.bf16.msra.mxu0 %v1589_v41 }
 0x135   :  { %v299_v47 = vpop.permute.xlu0 %298  ;;  %v265_v49 = vpop.permute.xlu1 %264  ;;  %v1639_v50 = vpack.c.bf16 %v263_v42, %v259_v43  ;;  %v1641_v52 = vpack.c.bf16 %v262_v46, %v258_v45 }
 0x136   :  { %v274_v55 = vsel %vm226_vm0, %v265_v49, %v267_v39 }
 0x137   :  { %700 = vrot.lane.b32.xlu0 %v2005_v3, %s1731_s24  ;;  %654 = vrot.lane.b32.xlu1 %v1975_v51, %s1731_s24  ;;  %v277_v60 = vmul.f32 %v274_v55, %v243_v15 }
 0x138   :  { %1640 = vmatprep.subr.bf16.mxu1 %v1639_v50 }
 0x139   :  { %1642 = vmatpush1.bf16.msra.mxu1 %v1641_v52  ;;  %v307_v56 = vpop.permute.xlu0 %306  ;;  %v295_v57 = vpop.permute.xlu1 %294 }
 0x13a   :  { %v315_v59 = vsel %vm310_vm1, %v295_v57, %v299_v47  ;;  %v317_v23 = vsel %vm310_vm1, %v307_v56, %v295_v57 }
 0x13b   :  { %734 = vrot.lane.b32.xlu0 %v1983_v17, %s1732_s26  ;;  %v341_v61 = vmul.f32 %v327_v53, %v315_v59  ;;  %698 = vrot.lane.b32.xlu1 %v1981_v54, %s1731_s24  ;;  %v340_v15 = vmul.f32 %v323_v33, %v317_v23 }
 0x13d   :  { %v303_v63 = vpop.permute.xlu0 %302  ;;  %v271_v5 = vpop.permute.xlu1 %270  ;;  %v1591_v8 = vpack.c.bf16 %v341_v61, %v277_v60 }
 0x13e   :  { %v275_v11 = vsel %vm226_vm0, %v271_v5, %v265_v49  ;;  %v313_v20 = vsel %vm310_vm1, %v299_v47, %v303_v63  ;;  %v311_v21 = vsel %vm310_vm1, %v303_v63, %v307_v56  ;;  %v1573_v63 = vld [vmem:[%s2605_s2 + $0x2] ss:$8 sm:$0xf] }
 0x13f   :  { %726 = vrot.lane.b32.xlu0 %v1944_v32, %s1732_s26  ;;  %v276_v19 = vmul.f32 %v275_v11, %v239_v28  ;;  %730 = vrot.lane.b32.xlu1 %v1965_v48, %s1732_s26  ;;  %v342_v30 = vmul.f32 %v331_v14, %v313_v20  ;;  %v343_v0 = vmul.f32 %v335_v18, %v311_v21 }
 0x140   :  { %1592 = vmatprep.subr.bf16.mxu0 %v1591_v8 }
 0x141   :  { %v301_v26 = vpop.permute.xlu0 %300  ;;  %v269_v27 = vpop.permute.xlu1 %268  ;;  %v1593_v29 = vpack.c.bf16 %v340_v15, %v276_v19 }
 0x142   :  { %v272_v31 = vsel %vm226_vm0, %v269_v27, %v271_v5  ;;  %v273_v28 = vsel %vm226_vm0, %v267_v39, %v269_v27 }
 0x143   :  { %738 = vrot.lane.b32.xlu0 %v1975_v51, %s1732_s26  ;;  %v278_v34 = vmul.f32 %v273_v28, %v247_v36  ;;  %v279_v9 = vmul.f32 %v272_v31, %v2086_v35  ;;  %696 = vrot.lane.b32.xlu1 %v1991_v58, %s1731_s24 }
 0x144   :  { %1594 = vmatpush1.bf16.msra.mxu0 %v1593_v29  ;;  %v2194_v29 = vrot.slane %v1573_v63, %v2064_v16 }
 0x145   :  { %v351_v10 = vpop.permute.xlu0 %350  ;;  %v297_v13 = vpop.permute.xlu1 %296  ;;  %v1643_v1 = vpack.c.bf16 %v343_v0, %v279_v9  ;;  %v1645_v40 = vpack.c.bf16 %v342_v30, %v278_v34  ;;  %v2203_v9 = vrot.slane %v1573_v63, %v2074_v25 }
 0x146   :  { %v316_v36 = vsel %vm310_vm1, %v297_v13, %v301_v26 }
 0x147   :  { %736 = vrot.lane.b32.xlu0 %v1973_v2, %s1732_s26  ;;  %702 = vrot.lane.b32.xlu1 %v2000_v62, %s1731_s24  ;;  %v345_v12 = vmul.f32 %v327_v53, %v316_v36 }
 0x148   :  { %1644 = vmatprep.subr.bf16.mxu1 %v1643_v1 }
 0x149   :  { %1646 = vmatpush1.bf16.msra.mxu1 %v1645_v40  ;;  %v355_v35 = vpop.permute.xlu0 %354  ;;  %v349_v39 = vpop.permute.xlu1 %348 }
 0x14a   :  { %v358_v41 = vsel %vm310_vm1, %v349_v39, %v351_v10  ;;  %v359_v42 = vsel %vm310_vm1, %v355_v35, %v349_v39 }
 0x14b   :  { %784 = vrot.lane.b32.xlu0 %v2005_v3, %s1732_s26  ;;  %v361_v4 = vmul.f32 %v358_v41, %v327_v53  ;;  %732 = vrot.lane.b32.xlu1 %v1953_v38, %s1732_s26  ;;  %v360_v22 = vmul.f32 %v359_v42, %v323_v33 }
 0x14d   :  { %v353_v43 = vpop.permute.xlu0 %352  ;;  %v309_v45 = vpop.permute.xlu1 %308  ;;  %v1595_v46 = vpack.c.bf16 %v361_v4, %v345_v12 }
 0x14e   :  { %v318_v47 = vsel %vm310_vm1, %v309_v45, %v297_v13  ;;  %v357_v50 = vsel %vm310_vm1, %v351_v10, %v353_v43  ;;  %v356_v52 = vsel %vm310_vm1, %v353_v43, %v355_v35  ;;  %v2206_v10 = vrot.slane %v1573_v63, %v2072_v24 }
 0x14f   :  { %780 = vrot.lane.b32.xlu0 %v1991_v58, %s1732_s26  ;;  %v344_v49 = vmul.f32 %v323_v33, %v318_v47  ;;  %782 = vrot.lane.b32.xlu1 %v1981_v54, %s1732_s26  ;;  %v362_v57 = vmul.f32 %v357_v50, %v331_v14  ;;  %v363_v61 = vmul.f32 %v356_v52, %v335_v18 }
 0x150   :  { %1596 = vmatprep.subr.bf16.mxu0 %v1595_v46 }
 0x151   :  { %v381_v53 = vpop.permute.xlu0 %380  ;;  %v305_v55 = vpop.permute.xlu1 %304  ;;  %v1597_v56 = vpack.c.bf16 %v360_v22, %v344_v49  ;;  %v1574_v22 = vld [vmem:[%s2605_s2 + $0x3] ss:$8 sm:$0xf] }
 0x152   :  { %v312_v59 = vsel %vm310_vm1, %v305_v55, %v309_v45  ;;  %v314_v60 = vsel %vm310_vm1, %v301_v26, %v305_v55  ;;  %v893_v49 = vld [vmem:[%s2606_s7 + $0x8] sm:$0xff]  ;;  %v495_v55 = vrot.slane %v1574_v22, %v2054_v7 }
 0x153   :  { %786 = vrot.lane.b32.xlu0 %v2000_v62, %s1732_s26  ;;  %v346_v33 = vmul.f32 %v331_v14, %v314_v60  ;;  %v347_v23 = vmul.f32 %v335_v18, %v312_v59  ;;  %728 = vrot.lane.b32.xlu1 %v1951_v37, %s1732_s26  ;;  %v411_v14 = vrot.slane %v1573_v63, %v2054_v7  ;;  %v1005_v63 = vld [vmem:[%s2607_s8 + $0x8] sm:$0xff] }
 0x154   :  { %1598 = vmatpush1.bf16.msra.mxu0 %v1597_v56  ;;  %1579 = vmatprep.mubr.msk.f32.mxu0 %vm1016_vm3, %v893_v49 }
 0x155   :  { %v385_v5 = vpop.permute.xlu0 %384  ;;  %v379_v8 = vpop.permute.xlu1 %378  ;;  %v1647_v11 = vpack.c.bf16 %v363_v61, %v347_v23  ;;  %v1649_v15 = vpack.c.bf16 %v362_v57, %v346_v33  ;;  %1581 = vmatprep.mubr.msk.f32.mxu1 %vm1016_vm3, %v893_v49  ;;  %v491_v23 = vrot.slane %v1574_v22, %v2064_v16 }
 0x156   :  { %v400_v18 = vsel %vm394_vm2, %v381_v53, %v385_v5 }
 0x157   :  { %816 = vrot.lane.b32.xlu0 %v1953_v38, %s1733_s29  ;;  %740 = vrot.lane.b32.xlu1 %v1963_v44, %s1732_s26  ;;  %v429_v26 = vmul.f32 %v411_v14, %v400_v18 }
 0x158   :  { %1648 = vmatprep.subr.bf16.mxu1 %v1647_v11 }
 0x159   :  { %1650 = vmatpush1.bf16.msra.mxu1 %v1649_v15  ;;  %v393_v19 = vpop.permute.xlu0 %392  ;;  %v383_v20 = vpop.permute.xlu1 %382 }
 0x15a   :  { %v399_v21 = vsel %vm394_vm2, %v379_v8, %v383_v20  ;;  %v402_v30 = vsel %vm394_vm2, %v393_v19, %v381_v53 }
 0x15b   :  { %820 = vrot.lane.b32.xlu0 %v1973_v2, %s1733_s29  ;;  %v425_v27 = vmul.f32 %v411_v14, %v399_v21  ;;  %814 = vrot.lane.b32.xlu1 %v1965_v48, %s1733_s29  ;;  %v428_v13 = vmul.f32 %v2194_v29, %v402_v30 }
 0x15d   :  { %v389_v31 = vpop.permute.xlu0 %388  ;;  %v391_v28 = vpop.permute.xlu1 %390  ;;  %v1599_v0 = vpack.c.bf16 %v429_v26, %v425_v27  ;;  %v1177_v27 = vld [vmem:[%s2608_s9] sm:$0xff] }
 0x15e   :  { %v401_v34 = vsel %vm394_vm2, %v391_v28, %v379_v8  ;;  %v398_v40 = vsel %vm394_vm2, %v385_v5, %v389_v31  ;;  %v396_v36 = vsel %vm394_vm2, %v389_v31, %v393_v19  ;;  %v503_v19 = vrot.slane %v1574_v22, %v2072_v24 }
 0x15f   :  { %812 = vrot.lane.b32.xlu0 %v1951_v37, %s1733_s29  ;;  %v424_v1 = vmul.f32 %v2194_v29, %v401_v34  ;;  %818 = vrot.lane.b32.xlu1 %v1983_v17, %s1733_s29  ;;  %v430_v12 = vmul.f32 %v2203_v9, %v398_v40  ;;  %v431_v43 = vmul.f32 %v2206_v10, %v396_v36 }
 0x160   :  { %1600 = vmatprep.subr.bf16.mxu0 %v1599_v0 }
 0x161   :  { %v435_v35 = vpop.permute.xlu0 %434  ;;  %v387_v39 = vpop.permute.xlu1 %386  ;;  %v1601_v41 = vpack.c.bf16 %v428_v13, %v424_v1 }
 0x162   :  { %v395_v4 = vsel %vm394_vm2, %v387_v39, %v391_v28  ;;  %v397_v42 = vsel %vm394_vm2, %v383_v20, %v387_v39  ;;  %v1004_v28 = vld [vmem:[%s2607_s8] sm:$0xff] }
 0x163   :  { %824 = vrot.lane.b32.xlu0 %v1963_v44, %s1733_s29  ;;  %v426_v45 = vmul.f32 %v2203_v9, %v397_v42  ;;  %v427_v46 = vmul.f32 %v2206_v10, %v395_v4  ;;  %810 = vrot.lane.b32.xlu1 %v1944_v32, %s1733_s29 }
 0x164   :  { %1602 = vmatpush1.bf16.msra.mxu0 %v1601_v41 }
 0x165   :  { %v467_v47 = vpop.permute.xlu0 %466  ;;  %v433_v50 = vpop.permute.xlu1 %432  ;;  %v1651_v52 = vpack.c.bf16 %v431_v43, %v427_v46  ;;  %v1653_v53 = vpack.c.bf16 %v430_v12, %v426_v45  ;;  %v1178_v12 = vld [vmem:[%s2608_s9 + $0x8] sm:$0xff] }
 0x166   :  { %v442_v56 = vsel %vm394_vm2, %v433_v50, %v435_v35 }
 0x167   :  { %868 = vrot.lane.b32.xlu0 %v2005_v3, %s1733_s29  ;;  %822 = vrot.lane.b32.xlu1 %v1975_v51, %s1733_s29  ;;  %v445_v61 = vmul.f32 %v442_v56, %v411_v14  ;;  %v499_v14 = vrot.slane %v1574_v22, %v2074_v25 }
 0x168   :  { %1652 = vmatprep.subr.bf16.mxu1 %v1651_v52 }
 0x169   :  { %1654 = vmatpush1.bf16.msra.mxu1 %v1653_v53  ;;  %v475_v57 = vpop.permute.xlu0 %474  ;;  %v463_v59 = vpop.permute.xlu1 %462 }
 0x16a   :  { %v483_v60 = vsel %vm478_vm4, %v463_v59, %v467_v47  ;;  %v485_v5 = vsel %vm478_vm4, %v475_v57, %v463_v59  ;;  %v1575_v59 = vld [vmem:[%s2605_s2 + $0x5] ss:$8 sm:$0xf] }
 0x16b   :  { %870 = vrot.lane.b32.xlu0 %v2000_v62, %s1733_s29  ;;  %v509_v33 = vmul.f32 %v495_v55, %v483_v60  ;;  %866 = vrot.lane.b32.xlu1 %v1981_v54, %s1733_s29  ;;  %v508_v20 = vmul.f32 %v491_v23, %v485_v5  ;;  %v1611_v5 = vpack.c.bf16 %v1953_v38, %v1965_v48 }
 0x16c   :  { %v1613_v38 = vpack.c.bf16 %v1951_v37, %v1944_v32  ;;  %v599_v32 = vrot.slane %v1575_v59, %v2072_v24 }
 0x16d   :  { %v471_v8 = vpop.permute.xlu0 %470  ;;  %v439_v11 = vpop.permute.xlu1 %438  ;;  %v1603_v15 = vpack.c.bf16 %v509_v33, %v445_v61 }
 0x16e   :  { %v443_v18 = vsel %vm394_vm2, %v439_v11, %v433_v50  ;;  %v481_v26 = vsel %vm478_vm4, %v467_v47, %v471_v8  ;;  %v479_v30 = vsel %vm478_vm4, %v471_v8, %v475_v57 }
 0x16f   :  { %1013 = vperm.xlu0 %1709, %v1005_v63   ;;  %v444_v21 = vmul.f32 %v443_v18, %v2194_v29  ;;  %864 = vrot.lane.b32.xlu1 %v1991_v58, %s1733_s29  ;;  %v510_v34 = vmul.f32 %v499_v14, %v481_v26  ;;  %v511_v40 = vmul.f32 %v503_v19, %v479_v30 }
 0x170   :  { %1604 = vmatprep.subr.bf16.mxu0 %v1603_v15 }
 0x171   :  { %v469_v31 = vpop.permute.xlu0 %468  ;;  %v437_v29 = vpop.permute.xlu1 %436  ;;  %v1605_v0 = vpack.c.bf16 %v508_v20, %v444_v21 }
 0x172   :  { %v440_v13 = vsel %vm394_vm2, %v437_v29, %v439_v11  ;;  %v441_v1 = vsel %vm394_vm2, %v435_v35, %v437_v29  ;;  %v591_v11 = vrot.slane %v1575_v59, %v2054_v7  ;;  %v587_v29 = vrot.slane %v1575_v59, %v2064_v16 }
 0x173   :  { %1239 = vperm.xlu0 %1709, %v1177_v27   ;;  %v446_v36 = vmul.f32 %v441_v1, %v2203_v9  ;;  %v447_v39 = vmul.f32 %v440_v13, %v2206_v10  ;;  %1008 = vperm.xlu1 %1710, %v1004_v28   ;;  %v595_v28 = vrot.slane %v1575_v59, %v2074_v25 }
 0x174   :  { %1606 = vmatpush1.bf16.msra.mxu0 %v1605_v0 }
 0x175   :  { %v519_v41 = vpop.permute.xlu0 %518  ;;  %v465_v4 = vpop.permute.xlu1 %464  ;;  %v1655_v42 = vpack.c.bf16 %v511_v40, %v447_v39  ;;  %v1657_v43 = vpack.c.bf16 %v510_v34, %v446_v36 }
 0x176   :  { %v484_v35 = vsel %vm478_vm4, %v465_v4, %v469_v31 }
 0x177   :  { %1244 = vperm.xlu1 %1710, %v1178_v12   ;;  %1656 = vmatprep.subr.bf16.mxu1 %v1655_v42  ;;  %v513_v46 = vmul.f32 %v495_v55, %v484_v35 }
 0x178   :  { %1658 = vmatpush1.bf16.msra.mxu1 %v1657_v43 }
 0x179   :  { %v523_v45 = vpop.permute.xlu0 %522  ;;  %v517_v9 = vpop.permute.xlu1 %516 }
 0x17a   :  { %v526_v10 = vsel %vm478_vm4, %v517_v9, %v519_v41  ;;  %v527_v22 = vsel %vm478_vm4, %v523_v45, %v517_v9 }
 0x17b   :  { %v529_v47 = vmul.f32 %v526_v10, %v495_v55  ;;  %v528_v56 = vmul.f32 %v527_v22, %v491_v23 }
 0x17d   :  { %v521_v49 = vpop.permute.xlu0 %520  ;;  %v477_v50 = vpop.permute.xlu1 %476  ;;  %v1607_v52 = vpack.c.bf16 %v529_v47, %v513_v46 }
 0x17e   :  { %v486_v53 = vsel %vm478_vm4, %v477_v50, %v465_v4  ;;  %v524_v60 = vsel %vm478_vm4, %v521_v49, %v523_v45  ;;  %v525_v55 = vsel %vm478_vm4, %v519_v41, %v521_v49 }
 0x17f   :  { %v512_v57 = vmul.f32 %v491_v23, %v486_v53  ;;  %1608 = vmatprep.subr.bf16.mxu0 %v1607_v52  ;;  %v530_v15 = vmul.f32 %v525_v55, %v499_v14  ;;  %v531_v18 = vmul.f32 %v524_v60, %v503_v19 }
 0x181   :  { %v567_v61 = vpop.permute.xlu0 %566  ;;  %v473_v33 = vpop.permute.xlu1 %472  ;;  %v1609_v63 = vpack.c.bf16 %v528_v56, %v512_v57 }
 0x182   :  { %v480_v23 = vsel %vm478_vm4, %v473_v33, %v477_v50  ;;  %v482_v8 = vsel %vm478_vm4, %v469_v31, %v473_v33 }
 0x183   :  { %v514_v20 = vmul.f32 %v499_v14, %v482_v8  ;;  %v515_v21 = vmul.f32 %v503_v19, %v480_v23  ;;  %1610 = vmatpush1.bf16.msra.mxu0 %v1609_v63  ;;  %v1663_v14 = vpack.c.bf16 %v1963_v44, %v1975_v51  ;;  %v1665_v51 = vpack.c.bf16 %v1973_v2, %v1983_v17  ;;  %v1576_v63 = vld [vmem:[%s2605_s2 + $0x6] ss:$8 sm:$0xf] }
 0x184   :  { %1612 = vmatprep.subr.bf16.mxu0 %v1611_v5 }
 0x185   :  { %v571_v26 = vpop.permute.xlu0 %570  ;;  %v563_v27 = vpop.permute.xlu1 %562  ;;  %v1659_v48 = vpack.c.bf16 %v531_v18, %v515_v21  ;;  %v1661_v30 = vpack.c.bf16 %v530_v15, %v514_v20  ;;  %v675_v15 = vrot.slane %v1576_v63, %v2054_v7 }
 0x186   :  { %v577_v31 = vsel %vm574_vm5, %v563_v27, %v567_v61  ;;  %v575_v0 = vsel %vm574_vm5, %v567_v61, %v571_v26 }
 0x187   :  { %v605_v19 = vmul.f32 %v591_v11, %v577_v31  ;;  %1614 = vmatpush1.bf16.msra.mxu0 %v1613_v38  ;;  %1660 = vmatprep.subr.bf16.mxu1 %v1659_v48  ;;  %v606_v1 = vmul.f32 %v595_v28, %v575_v0  ;;  %v671_v48 = vrot.slane %v1576_v63, %v2064_v16 }
 0x188   :  { %1662 = vmatpush1.bf16.msra.mxu1 %v1661_v30 }
 0x189   :  { %v569_v37 = vpop.permute.xlu0 %568  ;;  %v559_v34 = vpop.permute.xlu1 %558  ;;  %1664 = vmatprep.subr.bf16.mxu1 %v1663_v14  ;;  %v1615_v13 = vpack.c.bf16 %v605_v19, %v1981_v54  ;;  %v1669_v42 = vpack.c.bf16 %v606_v1, %v2005_v3 }
 0x18a   :  { %v579_v40 = vsel %vm574_vm5, %v559_v34, %v563_v27  ;;  %v581_v44 = vsel %vm574_vm5, %v571_v26, %v559_v34 }
 0x18b   :  { %v604_v36 = vmul.f32 %v587_v29, %v579_v40  ;;  %v607_v39 = vmul.f32 %v599_v32, %v581_v44  ;;  %1616 = vmatprep.subr.bf16.mxu0 %v1615_v13 }
 0x18c   :  { %1666 = vmatpush1.bf16.msra.mxu1 %v1665_v51 }
 0x18d   :  { %v617_v41 = vpop.permute.xlu0 %616  ;;  %v565_v12 = vpop.permute.xlu1 %564  ;;  %v1617_v4 = vpack.c.bf16 %v604_v36, %v1991_v58  ;;  %v1667_v54 = vpack.c.bf16 %v607_v39, %v2000_v62 }
 0x18e   :  { %v578_v43 = vsel %vm574_vm5, %v565_v12, %v569_v37 }
 0x18f   :  { %1618 = vmatpush1.bf16.msra.mxu0 %v1617_v4  ;;  %1668 = vmatprep.subr.bf16.mxu1 %v1667_v54  ;;  %v609_v45 = vmul.f32 %v591_v11, %v578_v43 }
 0x190   :  { %1670 = vmatpush1.bf16.msra.mxu1 %v1669_v42  ;;  %v1577_v42 = vld [vmem:[%s2605_s2 + $0x7] ss:$8 sm:$0xf] }
 0x191   :  { %v613_v35 = vpop.permute.xlu0 %612  ;;  %v615_v2 = vpop.permute.xlu1 %614 }
 0x192   :  { %v621_v17 = vsel %vm574_vm5, %v615_v2, %v617_v41  ;;  %v622_v58 = vsel %vm574_vm5, %v613_v35, %v615_v2 }
 0x193   :  { %v625_v9 = vmul.f32 %v621_v17, %v591_v11  ;;  %v624_v47 = vmul.f32 %v622_v58, %v587_v29  ;;  %v759_v17 = vrot.slane %v1577_v42, %v2054_v7 }
 0x195   :  { %v619_v10 = vpop.permute.xlu0 %618  ;;  %v561_v62 = vpop.permute.xlu1 %560  ;;  %v1619_v46 = vpack.c.bf16 %v625_v9, %v609_v45 }
 0x196   :  { %v580_v3 = vsel %vm574_vm5, %v561_v62, %v565_v12  ;;  %v620_v49 = vsel %vm574_vm5, %v617_v41, %v619_v10  ;;  %v623_v50 = vsel %vm574_vm5, %v619_v10, %v613_v35 }
 0x197   :  { %v608_v22 = vmul.f32 %v587_v29, %v580_v3  ;;  %1620 = vmatprep.subr.bf16.mxu0 %v1619_v46  ;;  %v626_v60 = vmul.f32 %v620_v49, %v595_v28  ;;  %v627_v55 = vmul.f32 %v623_v50, %v599_v32  ;;  %v755_v3 = vrot.slane %v1577_v42, %v2064_v16 }
 0x199   :  { %v649_v52 = vpop.permute.xlu0 %648  ;;  %v573_v53 = vpop.permute.xlu1 %572  ;;  %v1621_v56 = vpack.c.bf16 %v624_v47, %v608_v22 }
 0x19a   :  { %v576_v57 = vsel %vm574_vm5, %v569_v37, %v573_v53  ;;  %v582_v59 = vsel %vm574_vm5, %v573_v53, %v561_v62  ;;  %v683_v37 = vrot.slane %v1576_v63, %v2072_v24 }
 0x19b   :  { %v610_v61 = vmul.f32 %v595_v28, %v576_v57  ;;  %v611_v33 = vmul.f32 %v599_v32, %v582_v59  ;;  %1622 = vmatpush1.bf16.msra.mxu0 %v1621_v56  ;;  %v679_v32 = vrot.slane %v1576_v63, %v2074_v25  ;;  %v763_v57 = vrot.slane %v1577_v42, %v2074_v25 }
 0x19c   :  { %v767_v59 = vrot.slane %v1577_v42, %v2072_v24 }
 0x19d   :  { %v653_v5 = vpop.permute.xlu0 %652  ;;  %v647_v23 = vpop.permute.xlu1 %646  ;;  %v1671_v8 = vpack.c.bf16 %v627_v55, %v611_v33  ;;  %v1673_v11 = vpack.c.bf16 %v626_v60, %v610_v61 }
 0x19e   :  { %v662_v18 = vsel %vm658_vm6, %v649_v52, %v653_v5 }
 0x19f   :  { %1672 = vmatprep.subr.bf16.mxu1 %v1671_v8  ;;  %v693_v27 = vmul.f32 %v675_v15, %v662_v18 }
 0x1a0   :  { %1674 = vmatpush1.bf16.msra.mxu1 %v1673_v11 }
 0x1a1   :  { %v645_v20 = vpop.permute.xlu0 %644  ;;  %v651_v21 = vpop.permute.xlu1 %650 }
 0x1a2   :  { %v661_v26 = vsel %vm658_vm6, %v647_v23, %v651_v21  ;;  %v664_v30 = vsel %vm658_vm6, %v645_v20, %v649_v52 }
 0x1a3   :  { %v689_v38 = vmul.f32 %v675_v15, %v661_v26  ;;  %v692_v19 = vmul.f32 %v671_v48, %v664_v30 }
 0x1a5   :  { %v657_v31 = vpop.permute.xlu0 %656  ;;  %v643_v28 = vpop.permute.xlu1 %642  ;;  %v1623_v29 = vpack.c.bf16 %v693_v27, %v689_v38 }
 0x1a6   :  { %v663_v14 = vsel %vm658_vm6, %v643_v28, %v647_v23  ;;  %v660_v34 = vsel %vm658_vm6, %v653_v5, %v657_v31  ;;  %v666_v13 = vsel %vm658_vm6, %v657_v31, %v645_v20 }
 0x1a7   :  { %v688_v0 = vmul.f32 %v671_v48, %v663_v14  ;;  %1624 = vmatprep.subr.bf16.mxu0 %v1623_v29  ;;  %v694_v39 = vmul.f32 %v679_v32, %v660_v34  ;;  %v695_v41 = vmul.f32 %v683_v37, %v666_v13 }
 0x1a9   :  { %v701_v1 = vpop.permute.xlu0 %700  ;;  %v655_v40 = vpop.permute.xlu1 %654  ;;  %v1625_v44 = vpack.c.bf16 %v692_v19, %v688_v0 }
 0x1aa   :  { %v659_v51 = vsel %vm658_vm6, %v651_v21, %v655_v40  ;;  %v665_v36 = vsel %vm658_vm6, %v655_v40, %v643_v28 }
 0x1ab   :  { %v690_v12 = vmul.f32 %v679_v32, %v659_v51  ;;  %v691_v4 = vmul.f32 %v683_v37, %v665_v36  ;;  %1626 = vmatpush1.bf16.msra.mxu0 %v1625_v44 }
 0x1ad   :  { %v735_v54 = vpop.permute.xlu0 %734  ;;  %v699_v43 = vpop.permute.xlu1 %698  ;;  %v1675_v35 = vpack.c.bf16 %v695_v41, %v691_v4  ;;  %v1677_v2 = vpack.c.bf16 %v694_v39, %v690_v12 }
 0x1ae   :  { %v705_v45 = vsel %vm658_vm6, %v699_v43, %v701_v1 }
 0x1af   :  { %1676 = vmatprep.subr.bf16.mxu1 %v1675_v35  ;;  %v709_v62 = vmul.f32 %v705_v45, %v675_v15 }
 0x1b0   :  { %1678 = vmatpush1.bf16.msra.mxu1 %v1677_v2 }
 0x1b1   :  { %v727_v9 = vpop.permute.xlu0 %726  ;;  %v731_v58 = vpop.permute.xlu1 %730 }
 0x1b2   :  { %v745_v10 = vsel %vm742_vm7, %v731_v58, %v735_v54  ;;  %v747_v47 = vsel %vm742_vm7, %v727_v9, %v731_v58 }
 0x1b3   :  { %v773_v46 = vmul.f32 %v759_v17, %v745_v10  ;;  %v772_v53 = vmul.f32 %v755_v3, %v747_v47 }
 0x1b5   :  { %v739_v22 = vpop.permute.xlu0 %738  ;;  %v697_v49 = vpop.permute.xlu1 %696  ;;  %v1627_v50 = vpack.c.bf16 %v773_v46, %v709_v62 }
 0x1b6   :  { %v706_v52 = vsel %vm658_vm6, %v697_v49, %v699_v43  ;;  %v743_v60 = vsel %vm742_vm7, %v735_v54, %v739_v22  ;;  %v749_v55 = vsel %vm742_vm7, %v739_v22, %v727_v9  ;;  %v1578_v43 = vld [vmem:[%s2605_s2 + $0x20] ss:$8 sm:$0xf] }
 0x1b7   :  { %v708_v56 = vmul.f32 %v706_v52, %v671_v48  ;;  %1628 = vmatprep.subr.bf16.mxu0 %v1627_v50  ;;  %v774_v8 = vmul.f32 %v763_v57, %v743_v60  ;;  %v775_v11 = vmul.f32 %v767_v59, %v749_v55  ;;  %v843_v9 = vrot.slane %v1578_v43, %v2054_v7 }
 0x1b8   :  { %v839_v22 = vrot.slane %v1578_v43, %v2064_v16  ;;  %v851_v60 = vrot.slane %v1578_v43, %v2072_v24 }
 0x1b9   :  { %v737_v61 = vpop.permute.xlu0 %736  ;;  %v703_v33 = vpop.permute.xlu1 %702  ;;  %v1629_v63 = vpack.c.bf16 %v772_v53, %v708_v56 }
 0x1ba   :  { %v704_v5 = vsel %vm658_vm6, %v701_v1, %v703_v33  ;;  %v707_v23 = vsel %vm658_vm6, %v703_v33, %v697_v49 }
 0x1bb   :  { %v710_v15 = vmul.f32 %v704_v5, %v679_v32  ;;  %v711_v18 = vmul.f32 %v707_v23, %v683_v37  ;;  %1630 = vmatpush1.bf16.msra.mxu0 %v1629_v63 }
 0x1bd   :  { %v785_v20 = vpop.permute.xlu0 %784  ;;  %v733_v21 = vpop.permute.xlu1 %732  ;;  %v1679_v26 = vpack.c.bf16 %v775_v11, %v711_v18  ;;  %v1681_v27 = vpack.c.bf16 %v774_v8, %v710_v15 }
 0x1be   :  { %v746_v38 = vsel %vm742_vm7, %v733_v21, %v737_v61 }
 0x1bf   :  { %1680 = vmatprep.subr.bf16.mxu1 %v1679_v26  ;;  %v777_v28 = vmul.f32 %v759_v17, %v746_v38 }
 0x1c0   :  { %1682 = vmatpush1.bf16.msra.mxu1 %v1681_v27 }
 0x1c1   :  { %v781_v48 = vpop.permute.xlu0 %780  ;;  %v783_v30 = vpop.permute.xlu1 %782 }
 0x1c2   :  { %v789_v31 = vsel %vm742_vm7, %v783_v30, %v785_v20  ;;  %v790_v14 = vsel %vm742_vm7, %v781_v48, %v783_v30 }
 0x1c3   :  { %v793_v29 = vmul.f32 %v789_v31, %v759_v17  ;;  %v792_v34 = vmul.f32 %v790_v14, %v755_v3  ;;  %v892_v14 = vld [vmem:[%s2606_s7] sm:$0xff] }
 0x1c5   :  { %v787_v19 = vpop.permute.xlu0 %786  ;;  %v729_v0 = vpop.permute.xlu1 %728  ;;  %v1631_v32 = vpack.c.bf16 %v793_v29, %v777_v28 }
 0x1c6   :  { %v748_v37 = vsel %vm742_vm7, %v729_v0, %v733_v21  ;;  %v788_v1 = vsel %vm742_vm7, %v785_v20, %v787_v19  ;;  %v791_v40 = vsel %vm742_vm7, %v787_v19, %v781_v48 }
 0x1c7   :  { %v776_v13 = vmul.f32 %v755_v3, %v748_v37  ;;  %1632 = vmatprep.subr.bf16.mxu0 %v1631_v32  ;;  %v794_v12 = vmul.f32 %v788_v1, %v763_v57  ;;  %v795_v4 = vmul.f32 %v791_v40, %v767_v59 }
 0x1c9   :  { %v817_v44 = vpop.permute.xlu0 %816  ;;  %v741_v51 = vpop.permute.xlu1 %740  ;;  %v1633_v36 = vpack.c.bf16 %v792_v34, %v776_v13 }
 0x1ca   :  { %v744_v39 = vsel %vm742_vm7, %v737_v61, %v741_v51  ;;  %v750_v41 = vsel %vm742_vm7, %v741_v51, %v729_v0  ;;  %v895_v0 = vld [vmem:[%s2606_s7 + $0x18] sm:$0xff] }
 0x1cb   :  { %v778_v54 = vmul.f32 %v763_v57, %v744_v39  ;;  %v779_v42 = vmul.f32 %v767_v59, %v750_v41  ;;  %1634 = vmatpush1.bf16.msra.mxu0 %v1633_v36  ;;  %v847_v59 = vrot.slane %v1578_v43, %v2074_v25 }
 0x1cd   :  { %v821_v35 = vpop.permute.xlu0 %820  ;;  %v815_v2 = vpop.permute.xlu1 %814  ;;  %v1683_v17 = vpack.c.bf16 %v795_v4, %v779_v42  ;;  %v1685_v45 = vpack.c.bf16 %v794_v12, %v778_v54 }
 0x1ce   :  { %v830_v58 = vsel %vm826_vm8, %v817_v44, %v821_v35 }
 0x1cf   :  { %1684 = vmatprep.subr.bf16.mxu1 %v1683_v17  ;;  %v861_v3 = vmul.f32 %v843_v9, %v830_v58 }
 0x1d0   :  { %1686 = vmatpush1.bf16.msra.mxu1 %v1685_v45 }
 0x1d1   :  { %v813_v10 = vpop.permute.xlu0 %812  ;;  %v819_v62 = vpop.permute.xlu1 %818 }
 0x1d2   :  { %v829_v46 = vsel %vm826_vm8, %v815_v2, %v819_v62  ;;  %v832_v49 = vsel %vm826_vm8, %v813_v10, %v817_v44 }
 0x1d3   :  { %v857_v47 = vmul.f32 %v843_v9, %v829_v46  ;;  %v860_v56 = vmul.f32 %v839_v22, %v832_v49 }
 0x1d5   :  { %v825_v50 = vpop.permute.xlu0 %824  ;;  %v811_v52 = vpop.permute.xlu1 %810  ;;  %v1635_v7 = vpack.c.bf16 %v861_v3, %v857_v47 }
 0x1d6   :  { %v831_v53 = vsel %vm826_vm8, %v811_v52, %v815_v2  ;;  %v828_v55 = vsel %vm826_vm8, %v821_v35, %v825_v50  ;;  %v834_v16 = vsel %vm826_vm8, %v825_v50, %v813_v10 }
 0x1d7   :  { %v856_v57 = vmul.f32 %v839_v22, %v831_v53  ;;  %1636 = vmatprep.subr.bf16.mxu0 %v1635_v7  ;;  %v862_v8 = vmul.f32 %v847_v59, %v828_v55  ;;  %v863_v25 = vmul.f32 %v851_v60, %v834_v16  ;;  %v1179_v16 = vld [vmem:[%s2609_s10] sm:$0xff] }
 0x1d9   :  { %v869_v61 = vpop.permute.xlu0 %868  ;;  %v823_v33 = vpop.permute.xlu1 %822  ;;  %v1637_v63 = vpack.c.bf16 %v860_v56, %v856_v57 }
 0x1da   :  { %v827_v5 = vsel %vm826_vm8, %v819_v62, %v823_v33  ;;  %v833_v23 = vsel %vm826_vm8, %v823_v33, %v811_v52  ;;  %v1180_v33 = vld [vmem:[%s2609_s10 + $0x8] sm:$0xff] }
 0x1db   :  { %v858_v11 = vmul.f32 %v847_v59, %v827_v5  ;;  %v859_v24 = vmul.f32 %v851_v60, %v833_v23  ;;  %1638 = vmatpush1.bf16.msra.mxu0 %v1637_v63  ;;  %v1457_v63 = vld [vmem:[%s2611_s13 + $0x8] sm:$0xff]  ;;  %v1456_v23 = vld [vmem:[%s2611_s13] sm:$0xff] }
 0x1dc   :  { %v1284_v5 = vld [vmem:[%s2610_s12 + $0x8] sm:$0xff] }
 0x1dd   :  { %v867_v15 = vpop.permute.xlu1 %866  ;;  %v1687_v18 = vpack.c.bf16 %v863_v25, %v859_v24  ;;  %v1689_v20 = vpack.c.bf16 %v862_v8, %v858_v11  ;;  %v871_v26 = vpop.permute.xlu0 %870  ;;  %v1734_v8 = vmov 0.0  }
 0x1de   :  { %v873_v21 = vsel %vm826_vm8, %v867_v15, %v869_v61  ;;  %v872_v38 = vsel %vm826_vm8, %v869_v61, %v871_v26  ;;  %v1283_v61 = vld [vmem:[%s2610_s12] sm:$0xff] }
 0x1df   :  { %v877_v27 = vmul.f32 %v873_v21, %v843_v9  ;;  %1688 = vmatprep.subr.bf16.mxu1 %v1687_v18  ;;  %v878_v19 = vmul.f32 %v872_v38, %v847_v59 }
 0x1e0   :  { %1690 = vmatpush1.bf16.msra.mxu1 %v1689_v20 }
 0x1e1   :  { %v865_v48 = vpop.permute.xlu1 %864  ;;  %1075 = vmatprep.subr.mxu0 %v877_v27 }
 0x1e2   :  { %v874_v30 = vsel %vm826_vm8, %v865_v48, %v867_v15  ;;  %v875_v31 = vsel %vm826_vm8, %v871_v26, %v865_v48 }
 0x1e3   :  { %v876_v28 = vmul.f32 %v874_v30, %v839_v22  ;;  %v879_v29 = vmul.f32 %v875_v31, %v851_v60 }
 0x1e5   :  { %1076 = vmatpush1.msra.mxu0 %v876_v28  ;;  %1152 = vmatprep.subr.mxu1 %v879_v29 }
 0x1e6   :  { %1088 = vmatmul.mubr.f32.vlgmr.msra.gmra.mrb[0].mxu0 %v892_v14  ;;  %1153 = vmatpush1.msra.mxu1 %v878_v19 }
 0x1e7   :  { %1165 = vmatmul.mubr.f32.vlgmr.msra.gmra.mrb[0].mxu1 %v892_v14  ;;  %1580 = vmatprep.mubr.msk.f32.mxu0 %vm1016_vm3, %v895_v0 }
 0x1e8   :  { %1582 = vmatprep.mubr.msk.f32.mxu1 %vm1016_vm3, %v895_v0 }
 0x1ea   :  { %1094 = vmatmul.mubr.f32.gmra.mrb[2].mxu0 %v894_v6 }
 0x1eb   :  { %1171 = vmatmul.mubr.f32.gmra.mrb[2].mxu1 %v894_v6  ;;  %1366 = vmatprep.mubr.f32.mxu0 %v1734_v8 }
 0x1ec   :  { %1443 = vmatprep.mubr.f32.mxu1 %v1734_v8 }
 0x1ee   :  { %v1014_v39 = vpop.permute.xlu0 %1013 }
 0x1f2   :  { %v1009_v32 = vpop.permute.xlu1 %1008  ;;  %v1240_v11 = vpop.permute.xlu0 %1239 }
 0x1f6   :  { %v1245_v25 = vpop.permute.xlu1 %1244 }
 0x2b9   :  { %v1089_v37 = vpop.f32.mrb[0].mxu0 }
 0x2ba   :  { %v2451_v34 = vadd.f32 %v1089_v37, %v1009_v32  ;;  %v1091_v13 = vpop.f32.mrb[1].mxu0  ;;  %v1166_v1 = vpop.f32.mrb[0].mxu1 }
 0x2bb   :  { %v2453_v40 = vadd.f32 %v1091_v13, %v1009_v32  ;;  %v1168_v44 = vpop.f32.mrb[1].mxu1  ;;  %v2457_v36 = vadd.f32 %v1166_v1, %v1009_v32 }
 0x2bc   :  { %v1193_v51 = vmul.f32 %v2451_v34, %v2451_v34  ;;  %v2463_v54 = vadd.f32 %v1168_v44, %v1009_v32 }
 0x2bd   :  { %v1181_v41 = vadd.f32 %v2453_v40, %v2451_v34  ;;  %v1194_v12 = vmul.f32 %v2453_v40, %v2453_v40  ;;  %v1095_v4 = vpop.f32.mrb[2].mxu0  ;;  %v1195_v10 = vmul.f32 %v2457_v36, %v2457_v36 }
 0x2be   :  { %v2465_v42 = vadd.f32 %v1095_v4, %v1014_v39  ;;  %v1097_v43 = vpop.f32.mrb[3].mxu0  ;;  %v1172_v35 = vpop.f32.mrb[2].mxu1  ;;  %v1196_v49 = vmul.f32 %v2463_v54, %v2463_v54 }
 0x2bf   :  { %v1201_v2 = vadd.f32 %v1194_v12, %v1193_v51  ;;  %v1182_v17 = vadd.f32 %v1181_v41, %v2457_v36  ;;  %v2468_v45 = vadd.f32 %v1097_v43, %v1014_v39  ;;  %v2470_v9 = vadd.f32 %v1172_v35, %v1014_v39  ;;  %v1174_v58 = vpop.f32.mrb[3].mxu1 }
 0x2c0   :  { %v1197_v62 = vmul.f32 %v2465_v42, %v2465_v42  ;;  %v2480_v47 = vadd.f32 %v1174_v58, %v1014_v39 }
 0x2c1   :  { %v1186_v46 = vadd.f32 %v2468_v45, %v2465_v42  ;;  %v1198_v3 = vmul.f32 %v2468_v45, %v2468_v45  ;;  %v1183_v22 = vadd.f32 %v1182_v17, %v2463_v54  ;;  %v1202_v50 = vadd.f32 %v1201_v2, %v1195_v10 }
 0x2c2   :  { %v1199_v7 = vmul.f32 %v2470_v9, %v2470_v9  ;;  %v1200_v57 = vmul.f32 %v2480_v47, %v2480_v47 }
 0x2c3   :  { %v1206_v52 = vadd.f32 %v1198_v3, %v1197_v62  ;;  %1184 = vadd.xlane.f32.xlu1 %v1183_v22  ;;  %v1187_v53 = vadd.f32 %v1186_v46, %v2470_v9  ;;  %v1203_v56 = vadd.f32 %v1202_v50, %v1196_v49 }
 0x2c5   :  { %v1207_v59 = vadd.f32 %v1206_v52, %v1199_v7  ;;  %1204 = vadd.xlane.f32.xlu0 %v1203_v56  ;;  %v1188_v55 = vadd.f32 %v1187_v53, %v2480_v47 }
 0x2c7   :  { %v1208_v60 = vadd.f32 %v1207_v59, %v1200_v57 }
 0x2c9   :  { %1209 = vadd.xlane.f32.xlu1 %v1208_v60  ;;  %1189 = vadd.xlane.f32.xlu0 %v1188_v55 }
 0x2da   :  { %1257 = vperm.xlu1 %1710, %v1179_v16  }
 0x2de   :  { %1287 = vperm.xlu1 %1710, %v1283_v61  }
 0x2df   :  { %1262 = vperm.xlu0 %1709, %v1180_v33  }
 0x2e2   :  { %1523 = vperm.xlu1 %1710, %v1457_v63  }
 0x2e3   :  { %1292 = vperm.xlu0 %1709, %v1284_v5  }
 0x2e7   :  { %1518 = vperm.xlu0 %1709, %v1456_v23  }
 0x350   :  { %v1185_v24 = vpop.xlane.xlu1 %1184 }
 0x351   :  { %v1191_v15 = vmul.f32 0.001953125, %v1185_v24  ;;  %v1282_v24 = vld [vmem:[%s2612_s11 + $0x8] sm:$0xff] }
 0x352   :  { %v1205_v20 = vpop.xlane.xlu0 %1204 }
 0x353   :  { %v1221_v18 = vmul.f32 %v1191_v15, %v1191_v15  ;;  %v1211_v21 = vmul.f32 0.001953125, %v1205_v20  ;;  %v1213_v19 = vsub.f32 %v2451_v34, %v1191_v15  ;;  %v1214_v0 = vsub.f32 %v2453_v40, %v1191_v15 }
 0x354   :  { %v1215_v32 = vsub.f32 %v2457_v36, %v1191_v15  ;;  %v1216_v37 = vsub.f32 %v2463_v54, %v1191_v15 }
 0x355   :  { %v1223_v26 = vsub.f32 %v1211_v21, %v1221_v18 }
 0x356   :  { %v1210_v27 = vpop.xlane.xlu1 %1209  ;;  %v1190_v38 = vpop.xlane.xlu0 %1189 }
 0x357   :  { %v1225_v48 = vadd.f32 1e-05, %v1223_v26  ;;  %v1192_v30 = vmul.f32 0.001953125, %v1190_v38  ;;  %v1212_v31 = vmul.f32 0.001953125, %v1210_v27 }
 0x359   :  { %1717 = vrsqrt.f32 %v1225_v48  ;;  %v1222_v28 = vmul.f32 %v1192_v30, %v1192_v30  ;;  %v1217_v12 = vsub.f32 %v2465_v42, %v1192_v30  ;;  %v1218_v4 = vsub.f32 %v2468_v45, %v1192_v30 }
 0x35a   :  { %v1219_v40 = vsub.f32 %v2470_v9, %v1192_v30  ;;  %v1220_v2 = vsub.f32 %v2480_v47, %v1192_v30  ;;  %v1258_v54 = vpop.permute.xlu1 %1257 }
 0x35b   :  { %v1224_v29 = vsub.f32 %v1212_v31, %v1222_v28 }
 0x35d   :  { %v1226_v14 = vadd.f32 1e-05, %v1224_v29 }
 0x35e   :  { %v1263_v52 = vpop.permute.xlu0 %1262  ;;  %v1288_v15 = vpop.permute.xlu1 %1287 }
 0x35f   :  { %1719 = vrsqrt.f32 %v1226_v14 }
 0x362   :  { %v1293_v31 = vpop.permute.xlu0 %1292 }
 0x363   :  { %v1718_v6 = vpop.eup %1717 }
 0x364   :  { %v1229_v13 = vmul.f32 %v1718_v6, %v1213_v19  ;;  %v1230_v1 = vmul.f32 %v1718_v6, %v1214_v0  ;;  %v1231_v44 = vmul.f32 %v1718_v6, %v1215_v32  ;;  %v1232_v51 = vmul.f32 %v1718_v6, %v1216_v37 }
 0x366   :  { %v1247_v39 = vmul.f32 %v1240_v11, %v1229_v13  ;;  %v1248_v41 = vmul.f32 %v1240_v11, %v1230_v1  ;;  %v1249_v35 = vmul.f32 %v1240_v11, %v1231_v44  ;;  %v1250_v34 = vmul.f32 %v1240_v11, %v1232_v51 }
 0x368   :  { %v1265_v62 = vadd.f32 %v1258_v54, %v1247_v39  ;;  %v1266_v46 = vadd.f32 %v1258_v54, %v1248_v41  ;;  %v1267_v49 = vadd.f32 %v1258_v54, %v1249_v35  ;;  %v1268_v42 = vadd.f32 %v1258_v54, %v1250_v34 }
 0x369   :  { %v1720_v43 = vpop.eup %1719 }
 0x36a   :  { %v1233_v36 = vmul.f32 %v1720_v43, %v1217_v12  ;;  %v1234_v17 = vmul.f32 %v1720_v43, %v1218_v4  ;;  %v1235_v58 = vmul.f32 %v1720_v43, %v1219_v40  ;;  %v1236_v10 = vmul.f32 %v1720_v43, %v1220_v2 }
 0x36b   :  { %v1273_v57 = vmax.f32 %v1265_v62, 0.0  ;;  %v1274_v59 = vmax.f32 %v1266_v46, 0.0  ;;  %v1275_v55 = vmax.f32 %v1267_v49, 0.0  ;;  %v1276_v61 = vmax.f32 %v1268_v42, 0.0  ;;  %v1458_v46 = vld [vmem:[%s2613_s14] sm:$0xff]  ;;  %v1519_v49 = vpop.permute.xlu0 %1518 }
 0x36c   :  { %v1251_v3 = vmul.f32 %v1245_v25, %v1233_v36  ;;  %v1252_v22 = vmul.f32 %v1245_v25, %v1234_v17  ;;  %v1253_v50 = vmul.f32 %v1245_v25, %v1235_v58  ;;  %v1254_v45 = vmul.f32 %v1245_v25, %v1236_v10  ;;  %v1281_v25 = vld [vmem:[%s2612_s11] sm:$0xff] }
 0x36e   :  { %v1269_v7 = vadd.f32 %v1263_v52, %v1251_v3  ;;  %v1270_v53 = vadd.f32 %v1263_v52, %v1252_v22  ;;  %v1271_v56 = vadd.f32 %v1263_v52, %v1253_v50  ;;  %v1272_v9 = vadd.f32 %v1263_v52, %v1254_v45  ;;  %v1459_v3 = vld [vmem:[%s2613_s14 + $0x8] sm:$0xff]  ;;  %v1524_v22 = vpop.permute.xlu1 %1523 }
 0x370   :  { %v1277_v47 = vmax.f32 %v1269_v7, 0.0  ;;  %v1278_v60 = vmax.f32 %v1270_v53, 0.0  ;;  %v1279_v16 = vmax.f32 %v1271_v56, 0.0  ;;  %v1280_v33 = vmax.f32 %v1272_v9, 0.0 }
 0x372   :  { %v1691_v63 = vpack.c.bf16 %v1278_v60, %v1274_v59  ;;  %v1693_v5 = vpack.c.bf16 %v1277_v47, %v1273_v57  ;;  %v1695_v23 = vpack.c.bf16 %v1280_v33, %v1276_v61  ;;  %v1697_v11 = vpack.c.bf16 %v1279_v16, %v1275_v55 }
 0x374   :  { %1692 = vmatprep.subr.bf16.mxu0 %v1691_v63  ;;  %1696 = vmatprep.subr.bf16.mxu1 %v1695_v23 }
 0x375   :  { %1694 = vmatpush1.bf16.msra.mxu0 %v1693_v5  ;;  %1698 = vmatpush1.bf16.msra.mxu1 %v1697_v11 }
 0x378   :  { %1583 = vmatmul.mubr.msk.f32.vlgmr.msra.gmra.mrb[4].mxu0 %vm1295_vm9, %v1281_v25  ;;  %1585 = vmatmul.mubr.msk.f32.vlgmr.msra.gmra.mrb[4].mxu1 %vm1295_vm9, %v1281_v25 }
 0x379   :  { %1372 = vmatprep.mubr.f32.mxu0 %v1734_v8  ;;  %1449 = vmatprep.mubr.f32.mxu1 %v1734_v8 }
 0x37c   :  { %1584 = vmatmul.mubr.msk.f32.gmra.mrb[6].mxu0 %vm1295_vm9, %v1282_v24  ;;  %1586 = vmatmul.mubr.msk.f32.gmra.mrb[6].mxu1 %vm1295_vm9, %v1282_v24 }
 0x44b   :  { %v1368_v18 = vpop.f32.mrb[4].mxu0  ;;  %v1445_v21 = vpop.f32.mrb[4].mxu1 }
 0x44c   :  { %v2527_v20 = vadd.f32 %v1368_v18, %v1288_v15  ;;  %v1370_v26 = vpop.f32.mrb[5].mxu0  ;;  %v1447_v38 = vpop.f32.mrb[5].mxu1  ;;  %v2533_v30 = vadd.f32 %v1445_v21, %v1288_v15 }
 0x44d   :  { %v2529_v27 = vadd.f32 %v1370_v26, %v1288_v15  ;;  %v1448_v14 = vadd.f32 %v1447_v38, %v1288_v15 }
 0x44e   :  { %v1472_v48 = vmul.f32 %v2527_v20, %v2527_v20  ;;  %v1474_v51 = vmul.f32 %v2533_v30, %v2533_v30 }
 0x44f   :  { %v1460_v8 = vadd.f32 %v2529_v27, %v2527_v20  ;;  %v1473_v28 = vmul.f32 %v2529_v27, %v2529_v27  ;;  %v1374_v29 = vpop.f32.mrb[6].mxu0  ;;  %v1451_v0 = vpop.f32.mrb[6].mxu1  ;;  %v1475_v35 = vmul.f32 %v1448_v14, %v1448_v14 }
 0x450   :  { %v2539_v19 = vadd.f32 %v1374_v29, %v1293_v31  ;;  %v1376_v6 = vpop.f32.mrb[7].mxu0  ;;  %v2541_v37 = vadd.f32 %v1451_v0, %v1293_v31  ;;  %v1453_v1 = vpop.f32.mrb[7].mxu1 }
 0x451   :  { %v1480_v32 = vadd.f32 %v1473_v28, %v1472_v48  ;;  %v2543_v13 = vadd.f32 %v1376_v6, %v1293_v31  ;;  %v1461_v44 = vadd.f32 %v1460_v8, %v2533_v30  ;;  %v2554_v4 = vadd.f32 %v1453_v1, %v1293_v31 }
 0x452   :  { %v1476_v39 = vmul.f32 %v2539_v19, %v2539_v19  ;;  %v1478_v40 = vmul.f32 %v2541_v37, %v2541_v37 }
 0x453   :  { %v1465_v41 = vadd.f32 %v2543_v13, %v2539_v19  ;;  %v1477_v12 = vmul.f32 %v2543_v13, %v2543_v13  ;;  %v1462_v43 = vadd.f32 %v1461_v44, %v1448_v14  ;;  %v1481_v34 = vadd.f32 %v1480_v32, %v1474_v51 }
 0x454   :  { %v1479_v54 = vmul.f32 %v2554_v4, %v2554_v4 }
 0x455   :  { %v1485_v2 = vadd.f32 %v1477_v12, %v1476_v39  ;;  %1463 = vadd.xlane.f32.xlu1 %v1462_v43  ;;  %v1482_v36 = vadd.f32 %v1481_v34, %v1475_v35  ;;  %v1466_v17 = vadd.f32 %v1465_v41, %v2541_v37 }
 0x457   :  { %v1486_v58 = vadd.f32 %v1485_v2, %v1478_v40  ;;  %1483 = vadd.xlane.f32.xlu0 %v1482_v36  ;;  %v1467_v62 = vadd.f32 %v1466_v17, %v2554_v4 }
 0x459   :  { %v1487_v10 = vadd.f32 %v1486_v58, %v1479_v54 }
 0x45b   :  { %1488 = vadd.xlane.f32.xlu1 %v1487_v10  ;;  %1468 = vadd.xlane.f32.xlu0 %v1467_v62 }
 0x46c   :  { %1536 = vperm.xlu1 %1710, %v1458_v46  }
 0x471   :  { %1541 = vperm.xlu0 %1709, %v1459_v3  }
 0x4e2   :  { %v1464_v42 = vpop.xlane.xlu1 %1463 }
 0x4e3   :  { %v1470_v50 = vmul.f32 0.001953125, %v1464_v42 }
 0x4e4   :  { %v1484_v52 = vpop.xlane.xlu0 %1483 }
 0x4e5   :  { %v1500_v45 = vmul.f32 %v1470_v50, %v1470_v50  ;;  %v1490_v7 = vmul.f32 0.001953125, %v1484_v52  ;;  %v1492_v61 = vsub.f32 %v2527_v20, %v1470_v50  ;;  %v1493_v33 = vsub.f32 %v2529_v27, %v1470_v50 }
 0x4e6   :  { %v1494_v63 = vsub.f32 %v2533_v30, %v1470_v50  ;;  %v1495_v5 = vsub.f32 %v1448_v14, %v1470_v50 }
 0x4e7   :  { %v1502_v53 = vsub.f32 %v1490_v7, %v1500_v45 }
 0x4e8   :  { %v1489_v56 = vpop.xlane.xlu1 %1488  ;;  %v1469_v9 = vpop.xlane.xlu0 %1468 }
 0x4e9   :  { %v1504_v57 = vadd.f32 1e-05, %v1502_v53  ;;  %v1471_v47 = vmul.f32 0.001953125, %v1469_v9  ;;  %v1491_v59 = vmul.f32 0.001953125, %v1489_v56 }
 0x4eb   :  { %1721 = vrsqrt.f32 %v1504_v57  ;;  %v1501_v60 = vmul.f32 %v1471_v47, %v1471_v47  ;;  %v1496_v27 = vsub.f32 %v2539_v19, %v1471_v47  ;;  %v1497_v30 = vsub.f32 %v2543_v13, %v1471_v47 }
 0x4ec   :  { %v1537_v48 = vpop.permute.xlu1 %1536  ;;  %v1498_v14 = vsub.f32 %v2541_v37, %v1471_v47  ;;  %v1499_v0 = vsub.f32 %v2554_v4, %v1471_v47 }
 0x4ed   :  { %v1503_v55 = vsub.f32 %v1491_v59, %v1501_v60 }
 0x4ef   :  { %v1505_v16 = vadd.f32 1e-05, %v1503_v55 }
 0x4f0   :  { %v1542_v43 = vpop.permute.xlu0 %1541 }
 0x4f1   :  { %1723 = vrsqrt.f32 %v1505_v16 }
 0x4f5   :  { %v1722_v23 = vpop.eup %1721 }
 0x4f6   :  { %v1508_v11 = vmul.f32 %v1722_v23, %v1492_v61  ;;  %v1509_v25 = vmul.f32 %v1722_v23, %v1493_v33  ;;  %v1510_v24 = vmul.f32 %v1722_v23, %v1494_v63  ;;  %v1511_v15 = vmul.f32 %v1722_v23, %v1495_v5 }
 0x4f8   :  { %v1526_v18 = vmul.f32 %v1519_v49, %v1508_v11  ;;  %v1527_v21 = vmul.f32 %v1519_v49, %v1509_v25  ;;  %v1528_v26 = vmul.f32 %v1519_v49, %v1510_v24  ;;  %v1529_v38 = vmul.f32 %v1519_v49, %v1511_v15 }
 0x4fa   :  { %v1544_v31 = vadd.f32 %v1537_v48, %v1526_v18  ;;  %v1545_v8 = vadd.f32 %v1537_v48, %v1527_v21  ;;  %v1546_v28 = vadd.f32 %v1537_v48, %v1528_v26  ;;  %v1547_v29 = vadd.f32 %v1537_v48, %v1529_v38 }
 0x4fb   :  { %v1724_v20 = vpop.eup %1723 }
 0x4fc   :  { %v1552_v6 = vmax.f32 %v1544_v31, 0.0  ;;  %v1553_v32 = vmax.f32 %v1545_v8, 0.0  ;;  %v1554_v1 = vmax.f32 %v1546_v28, 0.0  ;;  %v1555_v44 = vmax.f32 %v1547_v29, 0.0 }
 0x4fd   :  { %v1512_v51 = vmul.f32 %v1724_v20, %v1496_v27  ;;  %v1513_v39 = vmul.f32 %v1724_v20, %v1497_v30  ;;  %v1514_v41 = vmul.f32 %v1724_v20, %v1498_v14  ;;  %v1515_v12 = vmul.f32 %v1724_v20, %v1499_v0 }
 0x4fe   :  { %1560 = vst [vmem:[%s2614_s15] sm:$0xff] %v1552_v6  ;;  %1561 = vst [vmem:[%s2614_s15 + $0x8] sm:$0xff] %v1553_v32 }
 0x4ff   :  { %1562 = vst [vmem:[%s2614_s15 + $0x10] sm:$0xff] %v1554_v1  ;;  %1563 = vst [vmem:[%s2614_s15 + $0x18] sm:$0xff] %v1555_v44  ;;  %v1530_v19 = vmul.f32 %v1524_v22, %v1512_v51  ;;  %v1531_v37 = vmul.f32 %v1524_v22, %v1513_v39  ;;  %v1532_v13 = vmul.f32 %v1524_v22, %v1514_v41 }
 0x500   :  { %v1533_v4 = vmul.f32 %v1524_v22, %v1515_v12 }
 0x501   :  { %v1548_v35 = vadd.f32 %v1542_v43, %v1530_v19  ;;  %v1549_v34 = vadd.f32 %v1542_v43, %v1531_v37  ;;  %v1550_v40 = vadd.f32 %v1542_v43, %v1532_v13 }
 0x502   :  { %v1551_v2 = vadd.f32 %v1542_v43, %v1533_v4 }
 0x503   :  { %v1556_v36 = vmax.f32 %v1548_v35, 0.0  ;;  %v1557_v17 = vmax.f32 %v1549_v34, 0.0  ;;  %v1558_v54 = vmax.f32 %v1550_v40, 0.0 }
 0x504   :  { %v1559_v58 = vmax.f32 %v1551_v2, 0.0 }
 0x505   :  { %1564 = vst [vmem:[%s2614_s15 + $0x20] sm:$0xff] %v1556_v36  ;;  %1565 = vst [vmem:[%s2614_s15 + $0x28] sm:$0xff] %v1557_v17 }
 0x506   :  { %1566 = vst [vmem:[%s2614_s15 + $0x30] sm:$0xff] %v1558_v54  ;;  %1567 = vst [vmem:[%s2614_s15 + $0x38] sm:$0xff] %v1559_v58 }

</bundles_post_ra>
